<compile_context>
chip_gen: v7x
topology: tpu7x:2x2x1
jax: 0.10.0
libtpu: 0.0.40
codegen_flags: <defaults>
</compile_context>

<pallas_src>
import math

import jax
import jax.numpy as jnp
import numpy as np
from jax.experimental import pallas as pl
from jax.experimental.pallas import tpu as pltpu  # noqa: F401  (TPU backend assumed)

# ----------------------------- configuration -------------------------------
BATCH = 2
SEQ_LEN = 8          # Conv1d "channels" dimension
PRED_LEN = 4         # output steps
D_MODEL = 32         # feature dim (Conv1d "length", mapped to TPU lanes)
C_TOTAL = 2 * PRED_LEN + 2   # trans(P) + rot(P) + radius(1) + angle(1) conv out-channels
LN_EPS = 1e-5
BN_EPS = 1e-5
LANES = 128          # param-slab lane width


# --------------------------- param slab layout ------------------------------
def _param_shapes():
    D, S, B = D_MODEL, SEQ_LEN, BATCH
    shapes = {
        # fused CBS_1D conv taps (all 4 branches; BN scale pre-folded)
        "conv_w0": (C_TOTAL, S),
        "conv_w1": (C_TOTAL, S),
        "conv_w2": (C_TOTAL, S),
        "conv_shift": (C_TOTAL, 1),
        # constant batch-blocked lane-shift matrices for the k=3 / p=1 conv
        "shift_prev": (B * D, B * D),
        "shift_next": (B * D, B * D),
    }
    for rb in ("rb1", "rb2"):
        shapes[f"trans_{rb}_fc1_w"] = (D, 2 * D)
        shapes[f"trans_{rb}_fc1_b"] = (1, 2 * D)
        shapes[f"trans_{rb}_fc1_g"] = (1, 2 * D)
        shapes[f"trans_{rb}_fc1_beta"] = (1, 2 * D)
        shapes[f"trans_{rb}_fc2_w"] = (2 * D, D)
        shapes[f"trans_{rb}_fc2_b"] = (1, D)
        shapes[f"trans_{rb}_fc2_g"] = (1, D)
        shapes[f"trans_{rb}_fc2_beta"] = (1, D)
        shapes[f"trans_{rb}_norm_g"] = (1, D)
        shapes[f"trans_{rb}_norm_beta"] = (1, D)
    shapes["trans_out_w"] = (D, 3)
    shapes["trans_out_b"] = (1, 3)
    shapes["rot_l1_w"] = (D, D)
    shapes["rot_l1_b"] = (1, D)
    shapes["rot_l2_w"] = (D, 3)
    shapes["rot_l2_b"] = (1, 3)
    shapes["rad_l1_w"] = (D, D)
    shapes["rad_l1_b"] = (1, D)
    shapes["rad_l2_w"] = (D, 1)
    shapes["rad_l2_b"] = (1, 1)
    shapes["ang_w"] = (D, 2)
    shapes["ang_b"] = (1, 2)
    return shapes


def _build_layout(shapes):
    """Assign each leaf a row offset; multi-row leaves are 8-row aligned."""
    offsets, row = {}, 0
    for name, (r, c) in shapes.items():
        assert c <= LANES
        if r > 1:
            row += (-row) % 8
        offsets[name] = (row, r, c)
        row += r
    total_rows = row + (-row) % 8
    return offsets, total_rows


_SHAPES = _param_shapes()
_OFFSETS, _TOTAL_ROWS = _build_layout(_SHAPES)


# ------------------------------- kernel ------------------------------------
def _make_kernel(offsets):
    B, S, D, P = BATCH, SEQ_LEN, D_MODEL, PRED_LEN

    def kernel(x_ref, slab_ref, out_ref):
        def ld(name):
            off, r, c = offsets[name]
            return slab_ref[off:off + r, 0:c]

        def dense(h, name):
            return jnp.dot(h, ld(name + "_w"),
                           preferred_element_type=jnp.float32) + ld(name + "_b")

        def layernorm(y, name):
            mean = jnp.mean(y, axis=-1, keepdims=True)
            var = jnp.mean(y * y, axis=-1, keepdims=True) - mean * mean  # one pass
            return ((y - mean) * jax.lax.rsqrt(var + LN_EPS)
                    * ld(name + "_g") + ld(name + "_beta"))

        def silu(y):
            return y * jax.nn.sigmoid(y)

        # ---- batch-fused CBS_1D: Conv1d(k=3, p=1, no bias) + eval-BN + SiLU ----
        # X packs both batch elements along lanes: X[:, b*D + l] = x[b, :, l].
        X = jnp.concatenate([x_ref[b] for b in range(B)], axis=1)          # (S, B*D)
        # pad=1 taps via constant shift matrices on the MXU (zero at block edges)
        prev = jnp.dot(X, ld("shift_prev"), preferred_element_type=jnp.float32)
        nxt = jnp.dot(X, ld("shift_next"), preferred_element_type=jnp.float32)
        y = (jnp.dot(ld("conv_w0"), prev, preferred_element_type=jnp.float32)
             + jnp.dot(ld("conv_w1"), X, preferred_element_type=jnp.float32)
             + jnp.dot(ld("conv_w2"), nxt, preferred_element_type=jnp.float32)
             + ld("conv_shift"))                                           # (C_total, B*D)
        feat = silu(y)

        # per-branch features, batch-major rows (row = b*rows_per_branch + r)
        fb = [feat[:, b * D:(b + 1) * D] for b in range(B)]                # B x (C_total, D)
        trans_feat = jnp.concatenate([f[0:P] for f in fb], axis=0)         # (B*P, D)
        rot_feat = jnp.concatenate([f[P:2 * P] for f in fb], axis=0)       # (B*P, D)
        rad_feat = jnp.concatenate([f[2 * P:2 * P + 1] for f in fb], axis=0)       # (B, D)
        ang_feat = jnp.concatenate([f[2 * P + 1:2 * P + 2] for f in fb], axis=0)   # (B, D)

        # ---- trans branch: LinearResBlock x2 + Linear(D, 3) ----
        t = trans_feat
        for rb in ("rb1", "rb2"):
            res = t
            h1 = silu(layernorm(dense(t, f"trans_{rb}_fc1"), f"trans_{rb}_fc1"))
            h2 = layernorm(dense(h1, f"trans_{rb}_fc2"), f"trans_{rb}_fc2")
            t = silu(layernorm(h2 + res, f"trans_{rb}_norm"))
        trans_out = dense(t, "trans_out")                                   # (B*P, 3)

        # ---- rot / radius / init-angle heads ----
        rot_out = dense(silu(dense(rot_feat, "rot_l1")), "rot_l2")          # (B*P, 3)
        radius_b = jnp.maximum(
            dense(silu(dense(rad_feat, "rad_l1")), "rad_l2"), 0.0)          # (B, 1)
        ang = dense(ang_feat, "ang")                                        # (B, 2)

        # expand per-batch scalars over the P prediction steps (row = b*P + p)
        scal = jnp.concatenate([radius_b, ang], axis=1)                     # (B, 3) [r, th, ph]
        exp3 = jnp.concatenate(
            [jnp.broadcast_to(scal[b:b + 1, :], (P, 3)) for b in range(B)], axis=0)
        rad_rows, theta, phi = exp3[:, 0:1], exp3[:, 1:2], exp3[:, 2:3]

        # ---- geometry epilogue: spherical point + Rodrigues rotation ----
        sphi = jnp.sin(phi)
        p0 = jnp.concatenate(
            [sphi * jnp.cos(theta), sphi * jnp.sin(theta), jnp.cos(phi)], axis=1) * rad_rows
        px, py, pz = p0[:, 0:1], p0[:, 1:2], p0[:, 2:3]

        rx, ry, rz = rot_out[:, 0:1], rot_out[:, 1:2], rot_out[:, 2:3]
        angle = jnp.sqrt(rx * rx + ry * ry + rz * rz)
        inv = 1.0 / (angle + 1e-6)             # matches torch: axis = r / (|r| + 1e-6)
        axis_v = rot_out * inv                 # (B*P, 3)
        ax, ay, az = rx * inv, ry * inv, rz * inv
        c = jnp.cos(angle)
        s = jnp.sin(angle)

        dotp = ax * px + ay * py + az * pz
        cross_v = jnp.concatenate(
            [ay * pz - az * py, az * px - ax * pz, ax * py - ay * px], axis=1)

        pred = trans_out + c * p0 + (1.0 - c) * dotp * axis_v + s * cross_v

        # fused lane-packed output: [pred(3) | trans(3) | rot(3) | radius(1)]
        out_ref[...] = jnp.concatenate([pred, trans_out, rot_out, rad_rows], axis=1)

    return kernel


_KERNEL = _make_kernel(_OFFSETS)


# ----------------------------- parameter init ------------------------------
def init_param_slab(key):
    """Generate all module parameters and pack them into one (R, 128) slab."""
    keys = iter(jax.random.split(key, 64))

    def nk():
        return next(keys)

    arrays = {}

    def lin(prefix, i, o):
        arrays[prefix + "_w"] = jax.random.normal(nk(), (i, o), jnp.float32) / math.sqrt(i)
        arrays[prefix + "_b"] = jax.random.normal(nk(), (1, o), jnp.float32) * 0.02

    def lin_ln(prefix, i, o):   # custom Linear module: nn.Linear + LayerNorm (+ SiLU)
        lin(prefix, i, o)
        arrays[prefix + "_g"] = jnp.ones((1, o), jnp.float32)
        arrays[prefix + "_beta"] = jnp.zeros((1, o), jnp.float32)

    # Fused conv of the four CBS_1D branches (output-channel concat is exactly
    # equivalent to four independent Conv1d modules); eval-mode BN folded in.
    w_conv = jax.random.normal(nk(), (C_TOTAL, SEQ_LEN, 3), jnp.float32) / math.sqrt(3 * SEQ_LEN)
    bn_scale = 1.0 / math.sqrt(1.0 + BN_EPS)
    for t in range(3):
        arrays[f"conv_w{t}"] = w_conv[:, :, t] * bn_scale
    arrays["conv_shift"] = jnp.zeros((C_TOTAL, 1), jnp.float32)

    # Constant boundary-masked lane-shift matrices (Conv1d pad=1 taps on MXU).
    n = BATCH * D_MODEL
    mp = np.zeros((n, n), np.float32)
    mn = np.zeros((n, n), np.float32)
    for b in range(BATCH):
        for l in range(D_MODEL):
            col = b * D_MODEL + l
            if l > 0:
                mp[col - 1, col] = 1.0     # prev[:, l] = X[:, l-1]
            if l < D_MODEL - 1:
                mn[col + 1, col] = 1.0     # nxt[:, l]  = X[:, l+1]
    arrays["shift_prev"] = jnp.asarray(mp)
    arrays["shift_next"] = jnp.asarray(mn)

    for rb in ("rb1", "rb2"):
        lin_ln(f"trans_{rb}_fc1", D_MODEL, 2 * D_MODEL)
        lin_ln(f"trans_{rb}_fc2", 2 * D_MODEL, D_MODEL)
        arrays[f"trans_{rb}_norm_g"] = jnp.ones((1, D_MODEL), jnp.float32)
        arrays[f"trans_{rb}_norm_beta"] = jnp.zeros((1, D_MODEL), jnp.float32)
    lin("trans_out", D_MODEL, 3)
    lin("rot_l1", D_MODEL, D_MODEL)
    lin("rot_l2", D_MODEL, 3)
    lin("rad_l1", D_MODEL, D_MODEL)
    lin("rad_l2", D_MODEL, 1)
    lin("ang", D_MODEL, 2)

    slab = jnp.zeros((_TOTAL_ROWS, LANES), jnp.float32)
    for name, a in arrays.items():
        off, r, c = _OFFSETS[name]
        assert a.shape == (r, c), name
        slab = slab.at[off:off + r, :c].set(a.astype(jnp.float32))
    return slab


# ----------------------------- forward pass --------------------------------
@jax.jit
def forward(param_slab, x):
    B, P = BATCH, PRED_LEN
    out = pl.pallas_call(
        _KERNEL,
        out_shape=jax.ShapeDtypeStruct((B * P, 10), jnp.float32),
    )(x, param_slab)
    pred = out[:, 0:3].reshape(B, P, 3)
    trans = out[:, 3:6].reshape(B, P, 3)
    rot = out[:, 6:9].reshape(B, P, 3)
    rad = out[:, 9:10].reshape(B, P, 1)
    return pred, trans, rot, rad


# --------------------------------- main -------------------------------------
if __name__ == "__main__":
    key = jax.random.PRNGKey(0)
    pkey, xkey = jax.random.split(key)
    param_slab = init_param_slab(pkey)
    x = jax.random.normal(xkey, (BATCH, SEQ_LEN, D_MODEL), jnp.float32)

    outs = jax.block_until_ready(forward(param_slab, x))

    pred_coords, trans_out, rot_vec, radius_exp = outs
    assert pred_coords.shape == (BATCH, PRED_LEN, 3)
    assert trans_out.shape == (BATCH, PRED_LEN, 3)
    assert rot_vec.shape == (BATCH, PRED_LEN, 3)
    assert radius_exp.shape == (BATCH, PRED_LEN, 1)
    assert all(bool(jnp.all(jnp.isfinite(o))) for o in outs)
    print("KERNEL_OK")
</pallas_src>

<mosaic_0001>
module attributes {stable_mosaic.version = 11 : i64} {
  func.func @kernel(%arg0: memref<2x8x32xf32, #tpu.memory_space<vmem>>, %arg1: memref<656x128xf32, #tpu.memory_space<vmem>>, %arg2: memref<8x10xf32, #tpu.memory_space<vmem>>) attributes {dimension_semantics = [], scalar_prefetch = 0 : i64, scratch_operands = 0 : i64, tpu.core_type = #tpu.core_type<tc>} {
    %c0 = arith.constant 0 : index
    %c0_0 = arith.constant 0 : index
    %c0_1 = arith.constant 0 : index
    %0 = vector.load %arg0[%c0, %c0_0, %c0_1] : memref<2x8x32xf32, #tpu.memory_space<vmem>>, vector<1x8x32xf32>
    %1 = vector.shape_cast %0 : vector<1x8x32xf32> to vector<8x32xf32>
    %c1 = arith.constant 1 : index
    %c0_2 = arith.constant 0 : index
    %c0_3 = arith.constant 0 : index
    %2 = vector.load %arg0[%c1, %c0_2, %c0_3] : memref<2x8x32xf32, #tpu.memory_space<vmem>>, vector<1x8x32xf32>
    %3 = vector.shape_cast %2 : vector<1x8x32xf32> to vector<8x32xf32>
    %4 = tpu.concatenate %1, %3 in 1 : vector<8x32xf32>, vector<8x32xf32> -> vector<8x64xf32>
    %c64 = arith.constant 64 : index
    %c0_4 = arith.constant 0 : index
    %5 = vector.load %arg1[%c64, %c0_4] : memref<656x128xf32, #tpu.memory_space<vmem>>, vector<64x64xf32>
    %cst = arith.constant dense<0.000000e+00> : vector<8x64xf32>
    %6 = tpu.matmul %4, %5, %cst {dimension_numbers = #tpu.dot_dimension_numbers<[1], [0], [0], [1], [0, 0, 1, 1], [], []>} : vector<8x64xf32>, vector<64x64xf32>, vector<8x64xf32> -> vector<8x64xf32>
    %c128 = arith.constant 128 : index
    %c0_5 = arith.constant 0 : index
    %7 = vector.load %arg1[%c128, %c0_5] : memref<656x128xf32, #tpu.memory_space<vmem>>, vector<64x64xf32>
    %cst_6 = arith.constant dense<0.000000e+00> : vector<8x64xf32>
    %8 = tpu.matmul %4, %7, %cst_6 {dimension_numbers = #tpu.dot_dimension_numbers<[1], [0], [0], [1], [0, 0, 1, 1], [], []>} : vector<8x64xf32>, vector<64x64xf32>, vector<8x64xf32> -> vector<8x64xf32>
    %c0_7 = arith.constant 0 : index
    %c0_8 = arith.constant 0 : index
    %9 = vector.load %arg1[%c0_7, %c0_8] : memref<656x128xf32, #tpu.memory_space<vmem>>, vector<10x8xf32>
    %cst_9 = arith.constant dense<0.000000e+00> : vector<10x64xf32>
    %10 = tpu.matmul %9, %6, %cst_9 {dimension_numbers = #tpu.dot_dimension_numbers<[1], [0], [0], [1], [0, 0, 1, 1], [], []>} : vector<10x8xf32>, vector<8x64xf32>, vector<10x64xf32> -> vector<10x64xf32>
    %c16 = arith.constant 16 : index
    %c0_10 = arith.constant 0 : index
    %11 = vector.load %arg1[%c16, %c0_10] : memref<656x128xf32, #tpu.memory_space<vmem>>, vector<10x8xf32>
    %cst_11 = arith.constant dense<0.000000e+00> : vector<10x64xf32>
    %12 = tpu.matmul %11, %4, %cst_11 {dimension_numbers = #tpu.dot_dimension_numbers<[1], [0], [0], [1], [0, 0, 1, 1], [], []>} : vector<10x8xf32>, vector<8x64xf32>, vector<10x64xf32> -> vector<10x64xf32>
    %13 = arith.addf %10, %12 : vector<10x64xf32>
    %c32 = arith.constant 32 : index
    %c0_12 = arith.constant 0 : index
    %14 = vector.load %arg1[%c32, %c0_12] : memref<656x128xf32, #tpu.memory_space<vmem>>, vector<10x8xf32>
    %cst_13 = arith.constant dense<0.000000e+00> : vector<10x64xf32>
    %15 = tpu.matmul %14, %8, %cst_13 {dimension_numbers = #tpu.dot_dimension_numbers<[1], [0], [0], [1], [0, 0, 1, 1], [], []>} : vector<10x8xf32>, vector<8x64xf32>, vector<10x64xf32> -> vector<10x64xf32>
    %16 = arith.addf %13, %15 : vector<10x64xf32>
    %c48 = arith.constant 48 : index
    %c0_14 = arith.constant 0 : index
    %17 = vector.load %arg1[%c48, %c0_14] : memref<656x128xf32, #tpu.memory_space<vmem>>, vector<10x1xf32>
    %18 = vector.broadcast %17 : vector<10x1xf32> to vector<10x64xf32>
    %19 = arith.addf %16, %18 : vector<10x64xf32>
    %20 = arith.negf %19 : vector<10x64xf32>
    %21 = math.exp %20 : vector<10x64xf32>
    %cst_15 = arith.constant 1.000000e+00 : f32
    %22 = vector.broadcast %cst_15 : f32 to vector<10x64xf32>
    %23 = arith.addf %22, %21 : vector<10x64xf32>
    %24 = arith.divf %22, %23 : vector<10x64xf32>
    %25 = arith.mulf %19, %24 : vector<10x64xf32>
    %26 = vector.extract_strided_slice %25 {offsets = [0, 0], sizes = [10, 32], strides = [1, 1]} : vector<10x64xf32> to vector<10x32xf32>
    %27 = vector.extract_strided_slice %25 {offsets = [0, 32], sizes = [10, 32], strides = [1, 1]} : vector<10x64xf32> to vector<10x32xf32>
    %28 = vector.extract_strided_slice %26 {offsets = [0, 0], sizes = [4, 32], strides = [1, 1]} : vector<10x32xf32> to vector<4x32xf32>
    %29 = vector.extract_strided_slice %27 {offsets = [0, 0], sizes = [4, 32], strides = [1, 1]} : vector<10x32xf32> to vector<4x32xf32>
    %30 = tpu.concatenate %28, %29 in 0 : vector<4x32xf32>, vector<4x32xf32> -> vector<8x32xf32>
    %31 = vector.extract_strided_slice %26 {offsets = [4, 0], sizes = [4, 32], strides = [1, 1]} : vector<10x32xf32> to vector<4x32xf32>
    %32 = vector.extract_strided_slice %27 {offsets = [4, 0], sizes = [4, 32], strides = [1, 1]} : vector<10x32xf32> to vector<4x32xf32>
    %33 = tpu.concatenate %31, %32 in 0 : vector<4x32xf32>, vector<4x32xf32> -> vector<8x32xf32>
    %34 = vector.extract_strided_slice %26 {offsets = [8, 0], sizes = [1, 32], strides = [1, 1]} : vector<10x32xf32> to vector<1x32xf32>
    %35 = vector.extract_strided_slice %27 {offsets = [8, 0], sizes = [1, 32], strides = [1, 1]} : vector<10x32xf32> to vector<1x32xf32>
    %36 = tpu.concatenate %34, %35 in 0 : vector<1x32xf32>, vector<1x32xf32> -> vector<2x32xf32>
    %37 = vector.extract_strided_slice %26 {offsets = [9, 0], sizes = [1, 32], strides = [1, 1]} : vector<10x32xf32> to vector<1x32xf32>
    %38 = vector.extract_strided_slice %27 {offsets = [9, 0], sizes = [1, 32], strides = [1, 1]} : vector<10x32xf32> to vector<1x32xf32>
    %39 = tpu.concatenate %37, %38 in 0 : vector<1x32xf32>, vector<1x32xf32> -> vector<2x32xf32>
    %c192 = arith.constant 192 : index
    %c0_16 = arith.constant 0 : index
    %40 = vector.load %arg1[%c192, %c0_16] : memref<656x128xf32, #tpu.memory_space<vmem>>, vector<32x64xf32>
    %cst_17 = arith.constant dense<0.000000e+00> : vector<8x64xf32>
    %41 = tpu.matmul %30, %40, %cst_17 {dimension_numbers = #tpu.dot_dimension_numbers<[1], [0], [0], [1], [0, 0, 1, 1], [], []>} : vector<8x32xf32>, vector<32x64xf32>, vector<8x64xf32> -> vector<8x64xf32>
    %c224 = arith.constant 224 : index
    %c0_18 = arith.constant 0 : index
    %42 = vector.load %arg1[%c224, %c0_18] : memref<656x128xf32, #tpu.memory_space<vmem>>, vector<1x64xf32>
    %43 = vector.broadcast %42 : vector<1x64xf32> to vector<8x64xf32>
    %44 = arith.addf %41, %43 : vector<8x64xf32>
    %cst_19 = arith.constant dense<0.000000e+00> : vector<8xf32>
    %45 = vector.multi_reduction <add>, %44, %cst_19 [1] : vector<8x64xf32> to vector<8xf32>
    %46 = vector.shape_cast %45 : vector<8xf32> to vector<8x1xf32>
    %cst_20 = arith.constant 6.400000e+01 : f32
    %47 = vector.broadcast %cst_20 : f32 to vector<8x1xf32>
    %48 = arith.divf %46, %47 : vector<8x1xf32>
    %49 = arith.mulf %44, %44 : vector<8x64xf32>
    %cst_21 = arith.constant dense<0.000000e+00> : vector<8xf32>
    %50 = vector.multi_reduction <add>, %49, %cst_21 [1] : vector<8x64xf32> to vector<8xf32>
    %51 = vector.shape_cast %50 : vector<8xf32> to vector<8x1xf32>
    %cst_22 = arith.constant 6.400000e+01 : f32
    %52 = vector.broadcast %cst_22 : f32 to vector<8x1xf32>
    %53 = arith.divf %51, %52 : vector<8x1xf32>
    %54 = arith.mulf %48, %48 : vector<8x1xf32>
    %55 = arith.subf %53, %54 : vector<8x1xf32>
    %56 = vector.broadcast %48 : vector<8x1xf32> to vector<8x64xf32>
    %57 = arith.subf %44, %56 : vector<8x64xf32>
    %cst_23 = arith.constant 9.99999974E-6 : f32
    %58 = vector.broadcast %cst_23 : f32 to vector<8x1xf32>
    %59 = arith.addf %55, %58 : vector<8x1xf32>
    %60 = math.rsqrt %59 : vector<8x1xf32>
    %61 = vector.broadcast %60 : vector<8x1xf32> to vector<8x64xf32>
    %62 = arith.mulf %57, %61 : vector<8x64xf32>
    %c225 = arith.constant 225 : index
    %c0_24 = arith.constant 0 : index
    %63 = vector.load %arg1[%c225, %c0_24] : memref<656x128xf32, #tpu.memory_space<vmem>>, vector<1x64xf32>
    %64 = vector.broadcast %63 : vector<1x64xf32> to vector<8x64xf32>
    %65 = arith.mulf %62, %64 : vector<8x64xf32>
    %c226 = arith.constant 226 : index
    %c0_25 = arith.constant 0 : index
    %66 = vector.load %arg1[%c226, %c0_25] : memref<656x128xf32, #tpu.memory_space<vmem>>, vector<1x64xf32>
    %67 = vector.broadcast %66 : vector<1x64xf32> to vector<8x64xf32>
    %68 = arith.addf %65, %67 : vector<8x64xf32>
    %69 = arith.negf %68 : vector<8x64xf32>
    %70 = math.exp %69 : vector<8x64xf32>
    %cst_26 = arith.constant 1.000000e+00 : f32
    %71 = vector.broadcast %cst_26 : f32 to vector<8x64xf32>
    %72 = arith.addf %71, %70 : vector<8x64xf32>
    %73 = arith.divf %71, %72 : vector<8x64xf32>
    %74 = arith.mulf %68, %73 : vector<8x64xf32>
    %c232 = arith.constant 232 : index
    %c0_27 = arith.constant 0 : index
    %75 = vector.load %arg1[%c232, %c0_27] : memref<656x128xf32, #tpu.memory_space<vmem>>, vector<64x32xf32>
    %cst_28 = arith.constant dense<0.000000e+00> : vector<8x32xf32>
    %76 = tpu.matmul %74, %75, %cst_28 {dimension_numbers = #tpu.dot_dimension_numbers<[1], [0], [0], [1], [0, 0, 1, 1], [], []>} : vector<8x64xf32>, vector<64x32xf32>, vector<8x32xf32> -> vector<8x32xf32>
    %c296 = arith.constant 296 : index
    %c0_29 = arith.constant 0 : index
    %77 = vector.load %arg1[%c296, %c0_29] : memref<656x128xf32, #tpu.memory_space<vmem>>, vector<1x32xf32>
    %78 = vector.broadcast %77 : vector<1x32xf32> to vector<8x32xf32>
    %79 = arith.addf %76, %78 : vector<8x32xf32>
    %cst_30 = arith.constant dense<0.000000e+00> : vector<8xf32>
    %80 = vector.multi_reduction <add>, %79, %cst_30 [1] : vector<8x32xf32> to vector<8xf32>
    %81 = vector.shape_cast %80 : vector<8xf32> to vector<8x1xf32>
    %cst_31 = arith.constant 3.200000e+01 : f32
    %82 = vector.broadcast %cst_31 : f32 to vector<8x1xf32>
    %83 = arith.divf %81, %82 : vector<8x1xf32>
    %84 = arith.mulf %79, %79 : vector<8x32xf32>
    %cst_32 = arith.constant dense<0.000000e+00> : vector<8xf32>
    %85 = vector.multi_reduction <add>, %84, %cst_32 [1] : vector<8x32xf32> to vector<8xf32>
    %86 = vector.shape_cast %85 : vector<8xf32> to vector<8x1xf32>
    %cst_33 = arith.constant 3.200000e+01 : f32
    %87 = vector.broadcast %cst_33 : f32 to vector<8x1xf32>
    %88 = arith.divf %86, %87 : vector<8x1xf32>
    %89 = arith.mulf %83, %83 : vector<8x1xf32>
    %90 = arith.subf %88, %89 : vector<8x1xf32>
    %91 = vector.broadcast %83 : vector<8x1xf32> to vector<8x32xf32>
    %92 = arith.subf %79, %91 : vector<8x32xf32>
    %cst_34 = arith.constant 9.99999974E-6 : f32
    %93 = vector.broadcast %cst_34 : f32 to vector<8x1xf32>
    %94 = arith.addf %90, %93 : vector<8x1xf32>
    %95 = math.rsqrt %94 : vector<8x1xf32>
    %96 = vector.broadcast %95 : vector<8x1xf32> to vector<8x32xf32>
    %97 = arith.mulf %92, %96 : vector<8x32xf32>
    %c297 = arith.constant 297 : index
    %c0_35 = arith.constant 0 : index
    %98 = vector.load %arg1[%c297, %c0_35] : memref<656x128xf32, #tpu.memory_space<vmem>>, vector<1x32xf32>
    %99 = vector.broadcast %98 : vector<1x32xf32> to vector<8x32xf32>
    %100 = arith.mulf %97, %99 : vector<8x32xf32>
    %c298 = arith.constant 298 : index
    %c0_36 = arith.constant 0 : index
    %101 = vector.load %arg1[%c298, %c0_36] : memref<656x128xf32, #tpu.memory_space<vmem>>, vector<1x32xf32>
    %102 = vector.broadcast %101 : vector<1x32xf32> to vector<8x32xf32>
    %103 = arith.addf %100, %102 : vector<8x32xf32>
    %104 = arith.addf %103, %30 : vector<8x32xf32>
    %cst_37 = arith.constant dense<0.000000e+00> : vector<8xf32>
    %105 = vector.multi_reduction <add>, %104, %cst_37 [1] : vector<8x32xf32> to vector<8xf32>
    %106 = vector.shape_cast %105 : vector<8xf32> to vector<8x1xf32>
    %cst_38 = arith.constant 3.200000e+01 : f32
    %107 = vector.broadcast %cst_38 : f32 to vector<8x1xf32>
    %108 = arith.divf %106, %107 : vector<8x1xf32>
    %109 = arith.mulf %104, %104 : vector<8x32xf32>
    %cst_39 = arith.constant dense<0.000000e+00> : vector<8xf32>
    %110 = vector.multi_reduction <add>, %109, %cst_39 [1] : vector<8x32xf32> to vector<8xf32>
    %111 = vector.shape_cast %110 : vector<8xf32> to vector<8x1xf32>
    %cst_40 = arith.constant 3.200000e+01 : f32
    %112 = vector.broadcast %cst_40 : f32 to vector<8x1xf32>
    %113 = arith.divf %111, %112 : vector<8x1xf32>
    %114 = arith.mulf %108, %108 : vector<8x1xf32>
    %115 = arith.subf %113, %114 : vector<8x1xf32>
    %116 = vector.broadcast %108 : vector<8x1xf32> to vector<8x32xf32>
    %117 = arith.subf %104, %116 : vector<8x32xf32>
    %cst_41 = arith.constant 9.99999974E-6 : f32
    %118 = vector.broadcast %cst_41 : f32 to vector<8x1xf32>
    %119 = arith.addf %115, %118 : vector<8x1xf32>
    %120 = math.rsqrt %119 : vector<8x1xf32>
    %121 = vector.broadcast %120 : vector<8x1xf32> to vector<8x32xf32>
    %122 = arith.mulf %117, %121 : vector<8x32xf32>
    %c299 = arith.constant 299 : index
    %c0_42 = arith.constant 0 : index
    %123 = vector.load %arg1[%c299, %c0_42] : memref<656x128xf32, #tpu.memory_space<vmem>>, vector<1x32xf32>
    %124 = vector.broadcast %123 : vector<1x32xf32> to vector<8x32xf32>
    %125 = arith.mulf %122, %124 : vector<8x32xf32>
    %c300 = arith.constant 300 : index
    %c0_43 = arith.constant 0 : index
    %126 = vector.load %arg1[%c300, %c0_43] : memref<656x128xf32, #tpu.memory_space<vmem>>, vector<1x32xf32>
    %127 = vector.broadcast %126 : vector<1x32xf32> to vector<8x32xf32>
    %128 = arith.addf %125, %127 : vector<8x32xf32>
    %129 = arith.negf %128 : vector<8x32xf32>
    %130 = math.exp %129 : vector<8x32xf32>
    %cst_44 = arith.constant 1.000000e+00 : f32
    %131 = vector.broadcast %cst_44 : f32 to vector<8x32xf32>
    %132 = arith.addf %131, %130 : vector<8x32xf32>
    %133 = arith.divf %131, %132 : vector<8x32xf32>
    %134 = arith.mulf %128, %133 : vector<8x32xf32>
    %c304 = arith.constant 304 : index
    %c0_45 = arith.constant 0 : index
    %135 = vector.load %arg1[%c304, %c0_45] : memref<656x128xf32, #tpu.memory_space<vmem>>, vector<32x64xf32>
    %cst_46 = arith.constant dense<0.000000e+00> : vector<8x64xf32>
    %136 = tpu.matmul %134, %135, %cst_46 {dimension_numbers = #tpu.dot_dimension_numbers<[1], [0], [0], [1], [0, 0, 1, 1], [], []>} : vector<8x32xf32>, vector<32x64xf32>, vector<8x64xf32> -> vector<8x64xf32>
    %c336 = arith.constant 336 : index
    %c0_47 = arith.constant 0 : index
    %137 = vector.load %arg1[%c336, %c0_47] : memref<656x128xf32, #tpu.memory_space<vmem>>, vector<1x64xf32>
    %138 = vector.broadcast %137 : vector<1x64xf32> to vector<8x64xf32>
    %139 = arith.addf %136, %138 : vector<8x64xf32>
    %cst_48 = arith.constant dense<0.000000e+00> : vector<8xf32>
    %140 = vector.multi_reduction <add>, %139, %cst_48 [1] : vector<8x64xf32> to vector<8xf32>
    %141 = vector.shape_cast %140 : vector<8xf32> to vector<8x1xf32>
    %cst_49 = arith.constant 6.400000e+01 : f32
    %142 = vector.broadcast %cst_49 : f32 to vector<8x1xf32>
    %143 = arith.divf %141, %142 : vector<8x1xf32>
    %144 = arith.mulf %139, %139 : vector<8x64xf32>
    %cst_50 = arith.constant dense<0.000000e+00> : vector<8xf32>
    %145 = vector.multi_reduction <add>, %144, %cst_50 [1] : vector<8x64xf32> to vector<8xf32>
    %146 = vector.shape_cast %145 : vector<8xf32> to vector<8x1xf32>
    %cst_51 = arith.constant 6.400000e+01 : f32
    %147 = vector.broadcast %cst_51 : f32 to vector<8x1xf32>
    %148 = arith.divf %146, %147 : vector<8x1xf32>
    %149 = arith.mulf %143, %143 : vector<8x1xf32>
    %150 = arith.subf %148, %149 : vector<8x1xf32>
    %151 = vector.broadcast %143 : vector<8x1xf32> to vector<8x64xf32>
    %152 = arith.subf %139, %151 : vector<8x64xf32>
    %cst_52 = arith.constant 9.99999974E-6 : f32
    %153 = vector.broadcast %cst_52 : f32 to vector<8x1xf32>
    %154 = arith.addf %150, %153 : vector<8x1xf32>
    %155 = math.rsqrt %154 : vector<8x1xf32>
    %156 = vector.broadcast %155 : vector<8x1xf32> to vector<8x64xf32>
    %157 = arith.mulf %152, %156 : vector<8x64xf32>
    %c337 = arith.constant 337 : index
    %c0_53 = arith.constant 0 : index
    %158 = vector.load %arg1[%c337, %c0_53] : memref<656x128xf32, #tpu.memory_space<vmem>>, vector<1x64xf32>
    %159 = vector.broadcast %158 : vector<1x64xf32> to vector<8x64xf32>
    %160 = arith.mulf %157, %159 : vector<8x64xf32>
    %c338 = arith.constant 338 : index
    %c0_54 = arith.constant 0 : index
    %161 = vector.load %arg1[%c338, %c0_54] : memref<656x128xf32, #tpu.memory_space<vmem>>, vector<1x64xf32>
    %162 = vector.broadcast %161 : vector<1x64xf32> to vector<8x64xf32>
    %163 = arith.addf %160, %162 : vector<8x64xf32>
    %164 = arith.negf %163 : vector<8x64xf32>
    %165 = math.exp %164 : vector<8x64xf32>
    %cst_55 = arith.constant 1.000000e+00 : f32
    %166 = vector.broadcast %cst_55 : f32 to vector<8x64xf32>
    %167 = arith.addf %166, %165 : vector<8x64xf32>
    %168 = arith.divf %166, %167 : vector<8x64xf32>
    %169 = arith.mulf %163, %168 : vector<8x64xf32>
    %c344 = arith.constant 344 : index
    %c0_56 = arith.constant 0 : index
    %170 = vector.load %arg1[%c344, %c0_56] : memref<656x128xf32, #tpu.memory_space<vmem>>, vector<64x32xf32>
    %cst_57 = arith.constant dense<0.000000e+00> : vector<8x32xf32>
    %171 = tpu.matmul %169, %170, %cst_57 {dimension_numbers = #tpu.dot_dimension_numbers<[1], [0], [0], [1], [0, 0, 1, 1], [], []>} : vector<8x64xf32>, vector<64x32xf32>, vector<8x32xf32> -> vector<8x32xf32>
    %c408 = arith.constant 408 : index
    %c0_58 = arith.constant 0 : index
    %172 = vector.load %arg1[%c408, %c0_58] : memref<656x128xf32, #tpu.memory_space<vmem>>, vector<1x32xf32>
    %173 = vector.broadcast %172 : vector<1x32xf32> to vector<8x32xf32>
    %174 = arith.addf %171, %173 : vector<8x32xf32>
    %cst_59 = arith.constant dense<0.000000e+00> : vector<8xf32>
    %175 = vector.multi_reduction <add>, %174, %cst_59 [1] : vector<8x32xf32> to vector<8xf32>
    %176 = vector.shape_cast %175 : vector<8xf32> to vector<8x1xf32>
    %cst_60 = arith.constant 3.200000e+01 : f32
    %177 = vector.broadcast %cst_60 : f32 to vector<8x1xf32>
    %178 = arith.divf %176, %177 : vector<8x1xf32>
    %179 = arith.mulf %174, %174 : vector<8x32xf32>
    %cst_61 = arith.constant dense<0.000000e+00> : vector<8xf32>
    %180 = vector.multi_reduction <add>, %179, %cst_61 [1] : vector<8x32xf32> to vector<8xf32>
    %181 = vector.shape_cast %180 : vector<8xf32> to vector<8x1xf32>
    %cst_62 = arith.constant 3.200000e+01 : f32
    %182 = vector.broadcast %cst_62 : f32 to vector<8x1xf32>
    %183 = arith.divf %181, %182 : vector<8x1xf32>
    %184 = arith.mulf %178, %178 : vector<8x1xf32>
    %185 = arith.subf %183, %184 : vector<8x1xf32>
    %186 = vector.broadcast %178 : vector<8x1xf32> to vector<8x32xf32>
    %187 = arith.subf %174, %186 : vector<8x32xf32>
    %cst_63 = arith.constant 9.99999974E-6 : f32
    %188 = vector.broadcast %cst_63 : f32 to vector<8x1xf32>
    %189 = arith.addf %185, %188 : vector<8x1xf32>
    %190 = math.rsqrt %189 : vector<8x1xf32>
    %191 = vector.broadcast %190 : vector<8x1xf32> to vector<8x32xf32>
    %192 = arith.mulf %187, %191 : vector<8x32xf32>
    %c409 = arith.constant 409 : index
    %c0_64 = arith.constant 0 : index
    %193 = vector.load %arg1[%c409, %c0_64] : memref<656x128xf32, #tpu.memory_space<vmem>>, vector<1x32xf32>
    %194 = vector.broadcast %193 : vector<1x32xf32> to vector<8x32xf32>
    %195 = arith.mulf %192, %194 : vector<8x32xf32>
    %c410 = arith.constant 410 : index
    %c0_65 = arith.constant 0 : index
    %196 = vector.load %arg1[%c410, %c0_65] : memref<656x128xf32, #tpu.memory_space<vmem>>, vector<1x32xf32>
    %197 = vector.broadcast %196 : vector<1x32xf32> to vector<8x32xf32>
    %198 = arith.addf %195, %197 : vector<8x32xf32>
    %199 = arith.addf %198, %134 : vector<8x32xf32>
    %cst_66 = arith.constant dense<0.000000e+00> : vector<8xf32>
    %200 = vector.multi_reduction <add>, %199, %cst_66 [1] : vector<8x32xf32> to vector<8xf32>
    %201 = vector.shape_cast %200 : vector<8xf32> to vector<8x1xf32>
    %cst_67 = arith.constant 3.200000e+01 : f32
    %202 = vector.broadcast %cst_67 : f32 to vector<8x1xf32>
    %203 = arith.divf %201, %202 : vector<8x1xf32>
    %204 = arith.mulf %199, %199 : vector<8x32xf32>
    %cst_68 = arith.constant dense<0.000000e+00> : vector<8xf32>
    %205 = vector.multi_reduction <add>, %204, %cst_68 [1] : vector<8x32xf32> to vector<8xf32>
    %206 = vector.shape_cast %205 : vector<8xf32> to vector<8x1xf32>
    %cst_69 = arith.constant 3.200000e+01 : f32
    %207 = vector.broadcast %cst_69 : f32 to vector<8x1xf32>
    %208 = arith.divf %206, %207 : vector<8x1xf32>
    %209 = arith.mulf %203, %203 : vector<8x1xf32>
    %210 = arith.subf %208, %209 : vector<8x1xf32>
    %211 = vector.broadcast %203 : vector<8x1xf32> to vector<8x32xf32>
    %212 = arith.subf %199, %211 : vector<8x32xf32>
    %cst_70 = arith.constant 9.99999974E-6 : f32
    %213 = vector.broadcast %cst_70 : f32 to vector<8x1xf32>
    %214 = arith.addf %210, %213 : vector<8x1xf32>
    %215 = math.rsqrt %214 : vector<8x1xf32>
    %216 = vector.broadcast %215 : vector<8x1xf32> to vector<8x32xf32>
    %217 = arith.mulf %212, %216 : vector<8x32xf32>
    %c411 = arith.constant 411 : index
    %c0_71 = arith.constant 0 : index
    %218 = vector.load %arg1[%c411, %c0_71] : memref<656x128xf32, #tpu.memory_space<vmem>>, vector<1x32xf32>
    %219 = vector.broadcast %218 : vector<1x32xf32> to vector<8x32xf32>
    %220 = arith.mulf %217, %219 : vector<8x32xf32>
    %c412 = arith.constant 412 : index
    %c0_72 = arith.constant 0 : index
    %221 = vector.load %arg1[%c412, %c0_72] : memref<656x128xf32, #tpu.memory_space<vmem>>, vector<1x32xf32>
    %222 = vector.broadcast %221 : vector<1x32xf32> to vector<8x32xf32>
    %223 = arith.addf %220, %222 : vector<8x32xf32>
    %224 = arith.negf %223 : vector<8x32xf32>
    %225 = math.exp %224 : vector<8x32xf32>
    %cst_73 = arith.constant 1.000000e+00 : f32
    %226 = vector.broadcast %cst_73 : f32 to vector<8x32xf32>
    %227 = arith.addf %226, %225 : vector<8x32xf32>
    %228 = arith.divf %226, %227 : vector<8x32xf32>
    %229 = arith.mulf %223, %228 : vector<8x32xf32>
    %c416 = arith.constant 416 : index
    %c0_74 = arith.constant 0 : index
    %230 = vector.load %arg1[%c416, %c0_74] : memref<656x128xf32, #tpu.memory_space<vmem>>, vector<32x3xf32>
    %cst_75 = arith.constant dense<0.000000e+00> : vector<8x3xf32>
    %231 = tpu.matmul %229, %230, %cst_75 {dimension_numbers = #tpu.dot_dimension_numbers<[1], [0], [0], [1], [0, 0, 1, 1], [], []>} : vector<8x32xf32>, vector<32x3xf32>, vector<8x3xf32> -> vector<8x3xf32>
    %c448 = arith.constant 448 : index
    %c0_76 = arith.constant 0 : index
    %232 = vector.load %arg1[%c448, %c0_76] : memref<656x128xf32, #tpu.memory_space<vmem>>, vector<1x3xf32>
    %233 = vector.broadcast %232 : vector<1x3xf32> to vector<8x3xf32>
    %234 = arith.addf %231, %233 : vector<8x3xf32>
    %c456 = arith.constant 456 : index
    %c0_77 = arith.constant 0 : index
    %235 = vector.load %arg1[%c456, %c0_77] : memref<656x128xf32, #tpu.memory_space<vmem>>, vector<32x32xf32>
    %cst_78 = arith.constant dense<0.000000e+00> : vector<8x32xf32>
    %236 = tpu.matmul %33, %235, %cst_78 {dimension_numbers = #tpu.dot_dimension_numbers<[1], [0], [0], [1], [0, 0, 1, 1], [], []>} : vector<8x32xf32>, vector<32x32xf32>, vector<8x32xf32> -> vector<8x32xf32>
    %c488 = arith.constant 488 : index
    %c0_79 = arith.constant 0 : index
    %237 = vector.load %arg1[%c488, %c0_79] : memref<656x128xf32, #tpu.memory_space<vmem>>, vector<1x32xf32>
    %238 = vector.broadcast %237 : vector<1x32xf32> to vector<8x32xf32>
    %239 = arith.addf %236, %238 : vector<8x32xf32>
    %240 = arith.negf %239 : vector<8x32xf32>
    %241 = math.exp %240 : vector<8x32xf32>
    %cst_80 = arith.constant 1.000000e+00 : f32
    %242 = vector.broadcast %cst_80 : f32 to vector<8x32xf32>
    %243 = arith.addf %242, %241 : vector<8x32xf32>
    %244 = arith.divf %242, %243 : vector<8x32xf32>
    %245 = arith.mulf %239, %244 : vector<8x32xf32>
    %c496 = arith.constant 496 : index
    %c0_81 = arith.constant 0 : index
    %246 = vector.load %arg1[%c496, %c0_81] : memref<656x128xf32, #tpu.memory_space<vmem>>, vector<32x3xf32>
    %cst_82 = arith.constant dense<0.000000e+00> : vector<8x3xf32>
    %247 = tpu.matmul %245, %246, %cst_82 {dimension_numbers = #tpu.dot_dimension_numbers<[1], [0], [0], [1], [0, 0, 1, 1], [], []>} : vector<8x32xf32>, vector<32x3xf32>, vector<8x3xf32> -> vector<8x3xf32>
    %c528 = arith.constant 528 : index
    %c0_83 = arith.constant 0 : index
    %248 = vector.load %arg1[%c528, %c0_83] : memref<656x128xf32, #tpu.memory_space<vmem>>, vector<1x3xf32>
    %249 = vector.broadcast %248 : vector<1x3xf32> to vector<8x3xf32>
    %250 = arith.addf %247, %249 : vector<8x3xf32>
    %c536 = arith.constant 536 : index
    %c0_84 = arith.constant 0 : index
    %251 = vector.load %arg1[%c536, %c0_84] : memref<656x128xf32, #tpu.memory_space<vmem>>, vector<32x32xf32>
    %cst_85 = arith.constant dense<0.000000e+00> : vector<2x32xf32>
    %252 = tpu.matmul %36, %251, %cst_85 {dimension_numbers = #tpu.dot_dimension_numbers<[1], [0], [0], [1], [0, 0, 1, 1], [], []>} : vector<2x32xf32>, vector<32x32xf32>, vector<2x32xf32> -> vector<2x32xf32>
    %c568 = arith.constant 568 : index
    %c0_86 = arith.constant 0 : index
    %253 = vector.load %arg1[%c568, %c0_86] : memref<656x128xf32, #tpu.memory_space<vmem>>, vector<1x32xf32>
    %254 = vector.broadcast %253 : vector<1x32xf32> to vector<2x32xf32>
    %255 = arith.addf %252, %254 : vector<2x32xf32>
    %256 = arith.negf %255 : vector<2x32xf32>
    %257 = math.exp %256 : vector<2x32xf32>
    %cst_87 = arith.constant 1.000000e+00 : f32
    %258 = vector.broadcast %cst_87 : f32 to vector<2x32xf32>
    %259 = arith.addf %258, %257 : vector<2x32xf32>
    %260 = arith.divf %258, %259 : vector<2x32xf32>
    %261 = arith.mulf %255, %260 : vector<2x32xf32>
    %c576 = arith.constant 576 : index
    %c0_88 = arith.constant 0 : index
    %262 = vector.load %arg1[%c576, %c0_88] : memref<656x128xf32, #tpu.memory_space<vmem>>, vector<32x1xf32>
    %cst_89 = arith.constant dense<0.000000e+00> : vector<2x1xf32>
    %263 = tpu.matmul %261, %262, %cst_89 {dimension_numbers = #tpu.dot_dimension_numbers<[1], [0], [0], [1], [0, 0, 1, 1], [], []>} : vector<2x32xf32>, vector<32x1xf32>, vector<2x1xf32> -> vector<2x1xf32>
    %c608 = arith.constant 608 : index
    %c0_90 = arith.constant 0 : index
    %264 = vector.load %arg1[%c608, %c0_90] : memref<656x128xf32, #tpu.memory_space<vmem>>, vector<1x1xf32>
    %265 = vector.broadcast %264 : vector<1x1xf32> to vector<2x1xf32>
    %266 = arith.addf %263, %265 : vector<2x1xf32>
    %cst_91 = arith.constant 0.000000e+00 : f32
    %267 = vector.broadcast %cst_91 : f32 to vector<2x1xf32>
    %268 = arith.maximumf %266, %267 : vector<2x1xf32>
    %c616 = arith.constant 616 : index
    %c0_92 = arith.constant 0 : index
    %269 = vector.load %arg1[%c616, %c0_92] : memref<656x128xf32, #tpu.memory_space<vmem>>, vector<32x2xf32>
    %cst_93 = arith.constant dense<0.000000e+00> : vector<2x2xf32>
    %270 = tpu.matmul %39, %269, %cst_93 {dimension_numbers = #tpu.dot_dimension_numbers<[1], [0], [0], [1], [0, 0, 1, 1], [], []>} : vector<2x32xf32>, vector<32x2xf32>, vector<2x2xf32> -> vector<2x2xf32>
    %c648 = arith.constant 648 : index
    %c0_94 = arith.constant 0 : index
    %271 = vector.load %arg1[%c648, %c0_94] : memref<656x128xf32, #tpu.memory_space<vmem>>, vector<1x2xf32>
    %272 = vector.broadcast %271 : vector<1x2xf32> to vector<2x2xf32>
    %273 = arith.addf %270, %272 : vector<2x2xf32>
    %274 = tpu.concatenate %268, %273 in 1 : vector<2x1xf32>, vector<2x2xf32> -> vector<2x3xf32>
    %275 = vector.extract_strided_slice %274 {offsets = [0, 0], sizes = [1, 3], strides = [1, 1]} : vector<2x3xf32> to vector<1x3xf32>
    %276 = vector.shape_cast %275 : vector<1x3xf32> to vector<1x3xf32>
    %277 = vector.broadcast %276 : vector<1x3xf32> to vector<4x3xf32>
    %278 = vector.extract_strided_slice %274 {offsets = [1, 0], sizes = [1, 3], strides = [1, 1]} : vector<2x3xf32> to vector<1x3xf32>
    %279 = vector.shape_cast %278 : vector<1x3xf32> to vector<1x3xf32>
    %280 = vector.broadcast %279 : vector<1x3xf32> to vector<4x3xf32>
    %281 = tpu.concatenate %277, %280 in 0 : vector<4x3xf32>, vector<4x3xf32> -> vector<8x3xf32>
    %282 = vector.extract_strided_slice %281 {offsets = [0, 0], sizes = [8, 1], strides = [1, 1]} : vector<8x3xf32> to vector<8x1xf32>
    %283 = vector.extract_strided_slice %281 {offsets = [0, 1], sizes = [8, 1], strides = [1, 1]} : vector<8x3xf32> to vector<8x1xf32>
    %284 = vector.extract_strided_slice %281 {offsets = [0, 2], sizes = [8, 1], strides = [1, 1]} : vector<8x3xf32> to vector<8x1xf32>
    %285 = math.sin %284 : vector<8x1xf32>
    %286 = math.cos %283 : vector<8x1xf32>
    %287 = arith.mulf %285, %286 : vector<8x1xf32>
    %288 = math.sin %283 : vector<8x1xf32>
    %289 = arith.mulf %285, %288 : vector<8x1xf32>
    %290 = math.cos %284 : vector<8x1xf32>
    %291 = tpu.concatenate %287, %289, %290 in 1 : vector<8x1xf32>, vector<8x1xf32>, vector<8x1xf32> -> vector<8x3xf32>
    %292 = vector.broadcast %282 : vector<8x1xf32> to vector<8x3xf32>
    %293 = arith.mulf %291, %292 : vector<8x3xf32>
    %294 = vector.extract_strided_slice %293 {offsets = [0, 0], sizes = [8, 1], strides = [1, 1]} : vector<8x3xf32> to vector<8x1xf32>
    %295 = vector.extract_strided_slice %293 {offsets = [0, 1], sizes = [8, 1], strides = [1, 1]} : vector<8x3xf32> to vector<8x1xf32>
    %296 = vector.extract_strided_slice %293 {offsets = [0, 2], sizes = [8, 1], strides = [1, 1]} : vector<8x3xf32> to vector<8x1xf32>
    %297 = vector.extract_strided_slice %250 {offsets = [0, 0], sizes = [8, 1], strides = [1, 1]} : vector<8x3xf32> to vector<8x1xf32>
    %298 = vector.extract_strided_slice %250 {offsets = [0, 1], sizes = [8, 1], strides = [1, 1]} : vector<8x3xf32> to vector<8x1xf32>
    %299 = vector.extract_strided_slice %250 {offsets = [0, 2], sizes = [8, 1], strides = [1, 1]} : vector<8x3xf32> to vector<8x1xf32>
    %300 = arith.mulf %297, %297 : vector<8x1xf32>
    %301 = arith.mulf %298, %298 : vector<8x1xf32>
    %302 = arith.addf %300, %301 : vector<8x1xf32>
    %303 = arith.mulf %299, %299 : vector<8x1xf32>
    %304 = arith.addf %302, %303 : vector<8x1xf32>
    %305 = math.sqrt %304 : vector<8x1xf32>
    %cst_95 = arith.constant 9.99999997E-7 : f32
    %306 = vector.broadcast %cst_95 : f32 to vector<8x1xf32>
    %307 = arith.addf %305, %306 : vector<8x1xf32>
    %cst_96 = arith.constant 1.000000e+00 : f32
    %308 = vector.broadcast %cst_96 : f32 to vector<8x1xf32>
    %309 = arith.divf %308, %307 : vector<8x1xf32>
    %310 = vector.broadcast %309 : vector<8x1xf32> to vector<8x3xf32>
    %311 = arith.mulf %250, %310 : vector<8x3xf32>
    %312 = arith.mulf %297, %309 : vector<8x1xf32>
    %313 = arith.mulf %298, %309 : vector<8x1xf32>
    %314 = arith.mulf %299, %309 : vector<8x1xf32>
    %315 = math.cos %305 : vector<8x1xf32>
    %316 = math.sin %305 : vector<8x1xf32>
    %317 = arith.mulf %312, %294 : vector<8x1xf32>
    %318 = arith.mulf %313, %295 : vector<8x1xf32>
    %319 = arith.addf %317, %318 : vector<8x1xf32>
    %320 = arith.mulf %314, %296 : vector<8x1xf32>
    %321 = arith.addf %319, %320 : vector<8x1xf32>
    %322 = arith.mulf %313, %296 : vector<8x1xf32>
    %323 = arith.mulf %314, %295 : vector<8x1xf32>
    %324 = arith.subf %322, %323 : vector<8x1xf32>
    %325 = arith.mulf %314, %294 : vector<8x1xf32>
    %326 = arith.mulf %312, %296 : vector<8x1xf32>
    %327 = arith.subf %325, %326 : vector<8x1xf32>
    %328 = arith.mulf %312, %295 : vector<8x1xf32>
    %329 = arith.mulf %313, %294 : vector<8x1xf32>
    %330 = arith.subf %328, %329 : vector<8x1xf32>
    %331 = tpu.concatenate %324, %327, %330 in 1 : vector<8x1xf32>, vector<8x1xf32>, vector<8x1xf32> -> vector<8x3xf32>
    %332 = vector.broadcast %315 : vector<8x1xf32> to vector<8x3xf32>
    %333 = arith.mulf %332, %293 : vector<8x3xf32>
    %334 = arith.addf %234, %333 : vector<8x3xf32>
    %cst_97 = arith.constant 1.000000e+00 : f32
    %335 = vector.broadcast %cst_97 : f32 to vector<8x1xf32>
    %336 = arith.subf %335, %315 : vector<8x1xf32>
    %337 = arith.mulf %336, %321 : vector<8x1xf32>
    %338 = vector.broadcast %337 : vector<8x1xf32> to vector<8x3xf32>
    %339 = arith.mulf %338, %311 : vector<8x3xf32>
    %340 = arith.addf %334, %339 : vector<8x3xf32>
    %341 = vector.broadcast %316 : vector<8x1xf32> to vector<8x3xf32>
    %342 = arith.mulf %341, %331 : vector<8x3xf32>
    %343 = arith.addf %340, %342 : vector<8x3xf32>
    %344 = tpu.concatenate %343, %234, %250, %282 in 1 : vector<8x3xf32>, vector<8x3xf32>, vector<8x3xf32>, vector<8x1xf32> -> vector<8x10xf32>
    %c0_98 = arith.constant 0 : index
    %c0_99 = arith.constant 0 : index
    %345 = vector.load %arg2[%c0_98, %c0_99] : memref<8x10xf32, #tpu.memory_space<vmem>>, vector<8x10xf32>
    tpu.vector_store %arg2[%c0_98, %c0_99], %344 {strides = array<i32>} : memref<8x10xf32, #tpu.memory_space<vmem>>, vector<8x10xf32>,
    return
  }
}

</mosaic_0001>

<bundles_post_ra>
// kernel: forward.1
= control target key start
LH: loop header
LB: loop body
LE: loop exit
PB: predicated region body
PF: predicated region fallthrough
CT: control target
= control target key end

     0   :  { %7 = vsyncpa [#allocation3], 0  ;;  %s3045_s0 = inlined_call_operand.hbm [shape: f32[2,8,32], index: 0, kind: input, shape index: {}]   ;;  %s3046_s1 = inlined_call_operand.hbm [shape: f32[656,128], index: 1, kind: input, shape index: {}]   ;;  %s3047_s2 = inlined_call_operand.vmem [shape: f32[8,10], index: 2, kind: output, shape index: {}]  }
   0x1   :  { %8 = vsyncpa [#allocation5], 0  ;;  %s2715_s9 = smov [#allocation2]   ;;  %s2667_s13 = scalar_lea.hbm %s3045_s0, 256 }
   0x2   :  { %s14_s10 = sshll.u32 %s2715_s9, 4  ;;  %p2668_p0 = scmp.ne.s32.totalorder %s3045_s0, %s2667_s13  ;;  %s15_s10 = int_to_ptr.vmem [resolvable:$true] %s14_s10 }
   0x3   :  { %p2671_p1 = scmp.lt.u32.totalorder %s2667_s13, %s3045_s0 }
   0x5   :  { %p2673_p2 = pnand %p2671_p1, %p2668_p0 }
   0x7   :  { %2676 = shalt.err (!%p2673_p2)
}
   0x8   :  { %s2677_s18 = scalar_lea.vmem %s15_s10, 256  ;;  %p2682_p4 = scmp.lt.s32.totalorder %s15_s10, %s15_s10 }
   0x9   :  { %p2678_p3 = scmp.ne.s32.totalorder %s15_s10, %s2677_s18  ;;  %p2683_p5 = scmp.lt.s32.totalorder %s2677_s18, %s2677_s18 }
   0xb   :  { %p2684_p6 = por %p2683_p5, %p2682_p4 }
   0xd   :  { %p2685_p7 = pnand %p2684_p6, %p2678_p3 }
   0xf   :  { %2688 = shalt.err (!%p2685_p7)
}
  0x10   :  { %s2716_s19 = smov 128   ;;  %s2717_s20 = smov 8  }
  0x11   :  { %20 = dma.hbm_to_vmem [thread:$0]  %s3045_s0, 256, %s15_s10, [#allocation3], %s2716_s19, %s2716_s19, %s2717_s20  }
  0x12   :  { %s2718_s23 = smov [#allocation4]   ;;  %s2689_s27 = scalar_lea.hbm %s3046_s1, 10496 }
  0x13   :  { %s26_s24 = sshll.u32 %s2718_s23, 4  ;;  %p2690_p8 = scmp.ne.s32.totalorder %s3046_s1, %s2689_s27  ;;  %s27_s24 = int_to_ptr.vmem [resolvable:$true] %s26_s24 }
  0x14   :  { %p2693_p9 = scmp.lt.u32.totalorder %s2689_s27, %s3046_s1 }
  0x16   :  { %p2695_p10 = pnand %p2693_p9, %p2690_p8 }
  0x18   :  { %2698 = shalt.err (!%p2695_p10)
}
  0x19   :  { %s2699_s4 = scalar_lea.vmem %s27_s24, 10496  ;;  %p2704_p12 = scmp.lt.s32.totalorder %s27_s24, %s27_s24 }
  0x1a   :  { %p2700_p11 = scmp.ne.s32.totalorder %s27_s24, %s2699_s4  ;;  %p2705_p13 = scmp.lt.s32.totalorder %s2699_s4, %s2699_s4 }
  0x1c   :  { %p2706_p0 = por %p2705_p13, %p2704_p12 }
  0x1e   :  { %p2707_p1 = pnand %p2706_p0, %p2700_p11 }
  0x20   :  { %2710 = shalt.err (!%p2707_p1)
}
  0x21   :  { %32 = dma.hbm_to_vmem [thread:$0]  %s3046_s1, 10496, %s27_s24, [#allocation5], %s2716_s19, %s2716_s19, %s2717_s20  }
  0x22   :  { %2711 = dma.done.wait [#allocation3], 256  }
  0x23   :  { %2712 = vsyncadd [#allocation3], 4294967040 }
  0x24   :  { %2713 = dma.done.wait [#allocation5], 10496  }
  0x25   :  { %2714 = vsyncadd [#allocation5], 4294956800  ;;  %v2719_v0 = vmov 0.0|0.0   ;;  %vm2720_vm0 = vmmov 0   ;;  %v2721_v1 = vmov 0.0   ;;  %v41_v2 = vld [vmem:[#allocation2 + $0x8] sm:$0xff] }
  0x26   :  { %2478 = vmatprep.subr.bf16.mxu0 %v2719_v0  ;;  %2490 = vmatprep.subr.bf16.mxu1 %v2719_v0  ;;  %v48_v3 = vld [vmem:[#allocation4 + $0x40] sm:$0xff]  ;;  %v49_v4 = vld [vmem:[#allocation4 + $0x48] sm:$0xff]  ;;  %s2722_s1 = smov 32   ;;  %v50_v8 = vld [vmem:[#allocation4 + $0x50] sm:$0xff]  ;;  %vm46_vm1 = vcmask 261120   ;;  %vm56_vm2 = vcmask 523264  }
  0x27   :  { %2315 = vmatprep.mubr.msk.f32.mxu0 %vm2720_vm0, %v2721_v1  ;;  %2334 = vmatprep.mubr.msk.f32.mxu1 %vm2720_vm0, %v2721_v1  ;;  %v2479_v5 = vpack.c.bf16 %v49_v4, %v48_v3  ;;  %v130_v6 = vld [vmem:[#allocation4 + $0x80] sm:$0xff]  ;;  %v131_v7 = vld [vmem:[#allocation4 + $0x88] sm:$0xff]  ;;  %v51_v10 = vld [vmem:[#allocation4 + $0x58] sm:$0xff]  ;;  %vm212_vm3 = vcmask 64512   ;;  %v2723_v34 = vmov 0   ;;  %s2724_s6 = smov 96  }
  0x28   :  { %43 = vrot.lane.b32.xlu0 %v41_v2, %s2722_s1  ;;  %v2491_v9 = vpack.c.bf16 %v131_v7, %v130_v6  ;;  %v132_v11 = vld [vmem:[#allocation4 + $0x90] sm:$0xff]  ;;  %v133_v12 = vld [vmem:[#allocation4 + $0x98] sm:$0xff]  ;;  %v2482_v13 = vpack.c.bf16 %v51_v10, %v50_v8  ;;  %v52_v15 = vld [vmem:[#allocation4 + $0x60] sm:$0xff]  ;;  %2610 = vset.pattern.permute.xlu1 %v2723_v34  ;;  %vm493_vm4 = vcmask 1043456   ;;  %vm505_vm5 = vcmask 1040384   ;;  %s2725_s7 = smov 1  }
  0x29   :  { %2480 = vmatpush3.bf16.msra.mxu0 %v2479_v5  ;;  %v2494_v14 = vpack.c.bf16 %v133_v12, %v132_v11  ;;  %v53_v16 = vld [vmem:[#allocation4 + $0x68] sm:$0xff]  ;;  %v134_v17 = vld [vmem:[#allocation4 + $0xa0] sm:$0xff]  ;;  %v54_v21 = vld [vmem:[#allocation4 + $0x70] sm:$0xff]  ;;  %2609 = vset.pattern.permute.xlu0 %v2723_v34  ;;  %vm1554_vm6 = vcmask 7168   ;;  %s2732_s8 = smov 127   ;;  %s2733_s9 = smov 126  }
  0x2a   :  { %2492 = vmatpush3.bf16.msra.mxu1 %v2491_v9  ;;  %2481 = vmatprep.subr.bf16.mxu0 %v2719_v0  ;;  %v135_v18 = vld [vmem:[#allocation4 + $0xa8] sm:$0xff]  ;;  %v2485_v19 = vpack.c.bf16 %v53_v16, %v52_v15  ;;  %v55_v22 = vld [vmem:[#allocation4 + $0x78] sm:$0xff]  ;;  %v136_v23 = vld [vmem:[#allocation4 + $0xb0] sm:$0xff]  ;;  %s2734_s10 = smov 2   ;;  %s2735_s11 = smov 3  }
  0x2b   :  { %2493 = vmatprep.subr.bf16.mxu1 %v2719_v0  ;;  %v2497_v20 = vpack.c.bf16 %v135_v18, %v134_v17  ;;  %v137_v24 = vld [vmem:[#allocation4 + $0xb8] sm:$0xff]  ;;  %v2488_v25 = vpack.c.bf16 %v55_v22, %v54_v21  ;;  %v39_v27 = vld [vmem:[#allocation2] sm:$0xff]  ;;  %v208_v32 = vld [vmem:[#allocation4] sm:$0xff]  ;;  %s2736_s12 = smov 9   ;;  %s2737_s13 = smov 6  }
  0x2c   :  { %v2500_v26 = vpack.c.bf16 %v137_v24, %v136_v23  ;;  %v210_v29 = vld [vmem:[#allocation4 + $0x10] sm:$0xff]  ;;  %v211_v31 = vld [vmem:[#allocation4 + $0x18] sm:$0x3]  ;;  %v209_v37 = vld [vmem:[#allocation4 + $0x8] sm:$0x3] }
  0x2d   :  { %2483 = vmatpush3.bf16.msra.mxu0 %v2482_v13  ;;  %v460_v33 = vld [vmem:[#allocation4 + $0x30] sm:$0xff]  ;;  %v375_v40 = vld [vmem:[#allocation4 + $0x20] sm:$0xff]  ;;  %v376_v41 = vld [vmem:[#allocation4 + $0x28] sm:$0x3] }
  0x2e   :  { %2495 = vmatpush3.bf16.msra.mxu1 %v2494_v14  ;;  %2484 = vmatprep.subr.bf16.mxu0 %v2719_v0  ;;  %v513_v42 = vld [vmem:[#allocation4 + $0xc0] sm:$0xff]  ;;  %v514_v43 = vld [vmem:[#allocation4 + $0xc8] sm:$0xff]  ;;  %v515_v44 = vld [vmem:[#allocation4 + $0xd0] sm:$0xff] }
  0x2f   :  { %2496 = vmatprep.subr.bf16.mxu1 %v2719_v0  ;;  %464 = vperm.xlu0 %2609, %v460_v33   ;;  %v2503_v45 = vpack.c.bf16 %v514_v43, %v513_v42  ;;  %v516_v46 = vld [vmem:[#allocation4 + $0xd8] sm:$0xff]  ;;  %v2160_v60 = vld [vmem:[#allocation4 + $0xe0] ss:$0 sm:$0xff]  ;;  %v630_v5 = vld [vmem:[#allocation4 + $0xe8] sm:$0xff] }
  0x30   :  { %v2506_v47 = vpack.c.bf16 %v516_v46, %v515_v44  ;;  %v631_v6 = vld [vmem:[#allocation4 + $0xf0] sm:$0xff]  ;;  %v632_v7 = vld [vmem:[#allocation4 + $0xf8] sm:$0xff]  ;;  %v633_v9 = vld [vmem:[#allocation4 + $0x100] sm:$0xff] }
  0x31   :  { %2486 = vmatpush3.bf16.msra.mxu0 %v2485_v19  ;;  %v2509_v8 = vpack.c.bf16 %v631_v6, %v630_v5  ;;  %v2512_v10 = vpack.c.bf16 %v633_v9, %v632_v7  ;;  %v634_v11 = vld [vmem:[#allocation4 + $0x108] sm:$0xff]  ;;  %v635_v12 = vld [vmem:[#allocation4 + $0x110] sm:$0xff]  ;;  %v636_v14 = vld [vmem:[#allocation4 + $0x118] sm:$0xff] }
  0x32   :  { %2498 = vmatpush3.bf16.msra.mxu1 %v2497_v20  ;;  %2487 = vmatprep.subr.bf16.mxu0 %v2719_v0  ;;  %v2515_v13 = vpack.c.bf16 %v635_v12, %v634_v11  ;;  %v637_v15 = vld [vmem:[#allocation4 + $0x120] sm:$0xff]  ;;  %v782_v7 = vld [vmem:[#allocation4 + $0x148] sm:$0xff] }
  0x33   :  { %2499 = vmatprep.subr.bf16.mxu1 %v2719_v0  ;;  %v2518_v16 = vpack.c.bf16 %v637_v15, %v636_v14  ;;  %v781_v5 = vld [vmem:[#allocation4 + $0x140] sm:$0xff] }
  0x35   :  { %2489 = vmatpush3.bf16.msra.mxu0 %v2488_v25 }
  0x36   :  { %2501 = vmatpush3.bf16.msra.mxu1 %v2500_v26  ;;  %v2162_v26 = vld [vmem:[#allocation4 + $0xe1] ss:$0 sm:$0xff] }
  0x37   :  { %2502 = vmatprep.subr.bf16.mxu1 %v2719_v0 }
  0x9a   :  { %v44_v28 = vpop.permute.xlu0 %43 }
  0x9b   :  { %v47_v30 = vsel %vm46_vm1, %v39_v27, %v44_v28  ;;  %v2163_v28 = vld [vmem:[#allocation4 + $0xe2] ss:$0 sm:$0xff] }
  0x9c   :  { %2316 = vmatmul.mubr.msk.f32.vlgmr.msra.gmra.mrb[0].mxu0 %vm56_vm2, %v47_v30  ;;  %2335 = vmatmul.mubr.msk.f32.vlgmr.msra.gmra.mrb[0].mxu1 %vm56_vm2, %v47_v30 }
  0x9d   :  { %2337 = vmatprep.subr.mxu0 %v47_v30  ;;  %2339 = vmatprep.mubr.msk.f32.mxu0 %vm212_vm3, %v210_v29 }
  0x9e   :  { %2338 = vmatpush3.msra.mxu0 %v47_v30  ;;  %2360 = vmatprep.mubr.msk.f32.mxu1 %vm2720_vm0, %v2721_v1 }
  0x9f   :  { %2504 = vmatpush3.bf16.msra.mxu1 %v2503_v45 }
  0xa0   :  { %2340 = vmatmul.mubr.msk.f32.vlgmr.msra.gmra.mrb[2].mxu0 %vm212_vm3, %v211_v31  ;;  %2505 = vmatprep.subr.bf16.mxu1 %v2719_v0 }
  0xa1   :  { %2344 = vmatprep.mubr.msk.f32.mxu0 %vm212_vm3, %v208_v32 }
  0xa3   :  { %2507 = vmatpush3.bf16.msra.mxu1 %v2506_v47 }
  0xa4   :  { %2508 = vmatprep.subr.bf16.mxu1 %v2719_v0 }
  0xae   :  { %v465_v48 = vpop.permute.xlu0 %464 }
 0x16f   :  { %v126_v35 = vpop.f32.mrb[0].mxu0  ;;  %v204_v36 = vpop.f32.mrb[0].mxu1 }
 0x170   :  { %v2317_v38 = vpop.f32.mrb[1].mxu0  ;;  %v2336_v39 = vpop.f32.mrb[1].mxu1  ;;  %2342 = vmatprep.subr.mxu0 %v126_v35 }
 0x171   :  { %2343 = vmatpush3.msra.mxu0 %v126_v35 }
 0x172   :  { %2345 = vmatmul.mubr.msk.f32.vlgmr.msra.gmra.mrb[2].mxu0 %vm212_vm3, %v209_v37  ;;  %2347 = vmatprep.subr.mxu0 %v204_v36 }
 0x173   :  { %2348 = vmatpush3.msra.mxu0 %v204_v36  ;;  %2349 = vmatprep.mubr.msk.f32.mxu0 %vm212_vm3, %v375_v40  ;;  %v2165_v36 = vld [vmem:[#allocation4 + $0x128] ss:$0 sm:$0xff] }
 0x174   :  { %2520 = vmatprep.subr.bf16.mxu0 %v2719_v0 }
 0x17a   :  { %2350 = vmatmul.mubr.msk.f32.vlgmr.msra.gmra.mrb[2].mxu0 %vm212_vm3, %v376_v41 }
 0x17b   :  { %2390 = vmatprep.mubr.msk.f32.mxu0 %vm2720_vm0, %v2721_v1 }
 0x24d   :  { %v2806_v49 = vpop.f32.mrb[2].mxu0 }
 0x24e   :  { %v449_v50 = vpop.f32.mrb[3].mxu0 }
 0x24f   :  { %v472_v51 = vadd.f32 %v465_v48, %v449_v50 }
 0x251   :  { %v2158_v52 = vmul.f32 -1.442695, %v472_v51 }
 0x253   :  { %2611 = vpow2.f32 %v2158_v52 }
 0x25d   :  { %v2612_v53 = vpop.eup %2611 }
 0x25e   :  { %v480_v54 = vadd.f32 1.0, %v2612_v53  ;;  %v2167_v53 = vld [vmem:[#allocation4 + $0x129] ss:$0 sm:$0xff] }
 0x260   :  { %2613 = vrcp.f32 %v480_v54 }
 0x26a   :  { %v2614_v55 = vpop.eup %2613 }
 0x26b   :  { %v2808_v56 = vmul.f32 %v2614_v55, %v472_v51  ;;  %v2168_v55 = vld [vmem:[#allocation4 + $0x12a] ss:$0 sm:$0xff] }
 0x26d   :  { %v489_v57 = vrot.slane %v2808_v56, 4 }
 0x26f   :  { %490 = vrot.lane.b32.xlu1 %v489_v57, %s2724_s6 }
 0x2e1   :  { %v491_v58 = vpop.permute.xlu1 %490 }
 0x2e2   :  { %v2816_v59 = vsel %vm493_vm4, %v2808_v56, %v491_v58 }
 0x2e3   :  { %2361 = vmatmul.mubr.msk.f32.vlgmr.msra.gmra.mrb[2].mxu1 %vm46_vm1, %v2816_v59 }
 0x2e4   :  { %2379 = vmatprep.mubr.msk.f32.mxu1 %vm2720_vm0, %v2721_v1  ;;  %2510 = vmatpush3.bf16.msra.mxu1 %v2509_v8  ;;  %v2524_v8 = vpack.c.bf16 %v782_v7, %v781_v5  ;;  %v2177_v7 = vld [vmem:[#allocation4 + $0x198] ss:$0 sm:$0xff] }
 0x2e5   :  { %2511 = vmatprep.subr.bf16.mxu1 %v2719_v0 }
 0x2e8   :  { %2513 = vmatpush3.bf16.msra.mxu1 %v2512_v10 }
 0x2e9   :  { %2514 = vmatprep.subr.bf16.mxu1 %v2719_v0 }
 0x2ec   :  { %2516 = vmatpush3.bf16.msra.mxu1 %v2515_v13 }
 0x2ed   :  { %2517 = vmatprep.subr.bf16.mxu1 %v2719_v0 }
 0x2f0   :  { %2519 = vmatpush3.bf16.msra.mxu1 %v2518_v16 }
 0x2f1   :  { %2538 = vmatprep.subr.bf16.mxu1 %v2719_v0 }
 0x3b6   :  { %v591_v61 = vpop.f32.mrb[2].mxu1 }
 0x3b7   :  { %v592_v62 = vadd.f32 %v2160_v60, %v591_v61  ;;  %v2362_v63 = vpop.f32.mrb[3].mxu1 }
 0x3b9   :  { %v595_v2 = vsel %vm56_vm2, %v592_v62, 0.0  ;;  %v600_v3 = vmul.f32 %v592_v62, %v592_v62 }
 0x3ba   :  { %596 = vadd.xlane.f32.xlu1 %v595_v2 }
 0x3bb   :  { %v601_v4 = vsel %vm56_vm2, %v600_v3, 0.0  ;;  %v779_v3 = vld [vmem:[#allocation4 + $0x130] sm:$0xff] }
 0x3bc   :  { %602 = vadd.xlane.f32.xlu0 %v601_v4  ;;  %v780_v4 = vld [vmem:[#allocation4 + $0x138] sm:$0xff] }
 0x3bd   :  { %v2521_v6 = vpack.c.bf16 %v780_v4, %v779_v3 }
 0x3bf   :  { %2522 = vmatpush3.bf16.msra.mxu0 %v2521_v6 }
 0x3c0   :  { %2523 = vmatprep.subr.bf16.mxu0 %v2719_v0 }
 0x3c3   :  { %2525 = vmatpush3.bf16.msra.mxu0 %v2524_v8 }
 0x3c4   :  { %2526 = vmatprep.subr.bf16.mxu0 %v2719_v0 }
 0x447   :  { %v597_v17 = vpop.xlane.xlu1 %596 }
 0x448   :  { %v599_v18 = vmul.f32 0.015625, %v597_v17  ;;  %v2169_v17 = vld [vmem:[#allocation4 + $0x12b] ss:$0 sm:$0xff] }
 0x449   :  { %v603_v19 = vpop.xlane.xlu0 %602 }
 0x44a   :  { %v605_v20 = vmul.f32 %v599_v18, %v599_v18  ;;  %v604_v21 = vmul.f32 0.015625, %v603_v19  ;;  %v607_v24 = vsub.f32 %v592_v62, %v599_v18  ;;  %v2170_v19 = vld [vmem:[#allocation4 + $0x12c] ss:$0 sm:$0xff] }
 0x44c   :  { %v606_v22 = vsub.f32 %v604_v21, %v605_v20 }
 0x44e   :  { %v608_v23 = vadd.f32 1e-05, %v606_v22 }
 0x450   :  { %2615 = vrsqrt.f32 %v608_v23 }
 0x45a   :  { %v2616_v25 = vpop.eup %2615 }
 0x45b   :  { %v610_v27 = vmul.f32 %v2616_v25, %v607_v24 }
 0x45d   :  { %v616_v29 = vmul.f32 %v2162_v26, %v610_v27  ;;  %v2172_v27 = vld [vmem:[#allocation4 + $0x150] ss:$0 sm:$0xff] }
 0x45f   :  { %v622_v30 = vadd.f32 %v2163_v28, %v616_v29 }
 0x461   :  { %v2164_v31 = vmul.f32 -1.442695, %v622_v30 }
 0x463   :  { %2617 = vpow2.f32 %v2164_v31 }
 0x46d   :  { %v2618_v32 = vpop.eup %2617 }
 0x46e   :  { %v626_v33 = vadd.f32 1.0, %v2618_v32 }
 0x470   :  { %2619 = vrcp.f32 %v626_v33 }
 0x47a   :  { %v2620_v34 = vpop.eup %2619 }
 0x47b   :  { %v629_v35 = vmul.f32 %v2620_v34, %v622_v30  ;;  %v895_v34 = vld [vmem:[#allocation4 + $0x158] sm:$0xff] }
 0x47d   :  { %2380 = vmatmul.mubr.msk.f32.vlgmr.msra.gmra.mrb[4].mxu1 %vm56_vm2, %v629_v35  ;;  %v896_v35 = vld [vmem:[#allocation4 + $0x160] sm:$0xff] }
 0x47e   :  { %2420 = vmatprep.mubr.msk.f32.mxu1 %vm2720_vm0, %v2721_v1 }
 0x550   :  { %v712_v37 = vpop.f32.mrb[4].mxu1 }
 0x551   :  { %v713_v38 = vadd.f32 %v2165_v36, %v712_v37  ;;  %v2381_v39 = vpop.f32.mrb[5].mxu1  ;;  %v897_v36 = vld [vmem:[#allocation4 + $0x168] sm:$0xff]  ;;  %v2527_v37 = vpack.c.bf16 %v896_v35, %v895_v34 }
 0x553   :  { %v716_v40 = vsel %vm46_vm1, %v713_v38, 0.0  ;;  %v721_v41 = vmul.f32 %v713_v38, %v713_v38 }
 0x554   :  { %717 = vadd.xlane.f32.xlu1 %v716_v40  ;;  %v899_v40 = vld [vmem:[#allocation4 + $0x178] sm:$0xff] }
 0x555   :  { %v722_v42 = vsel %vm46_vm1, %v721_v41, 0.0  ;;  %v900_v41 = vld [vmem:[#allocation4 + $0x180] sm:$0xff] }
 0x556   :  { %723 = vadd.xlane.f32.xlu0 %v722_v42  ;;  %v2533_v42 = vpack.c.bf16 %v900_v41, %v899_v40  ;;  %v1044_v40 = vld [vmem:[#allocation4 + $0x1a8] sm:$0xff]  ;;  %v1045_v41 = vld [vmem:[#allocation4 + $0x1b0] sm:$0xff] }
 0x5e1   :  { %v718_v43 = vpop.xlane.xlu1 %717 }
 0x5e2   :  { %v720_v44 = vmul.f32 0.03125, %v718_v43  ;;  %v901_v43 = vld [vmem:[#allocation4 + $0x188] sm:$0xff] }
 0x5e3   :  { %v724_v45 = vpop.xlane.xlu0 %723 }
 0x5e4   :  { %v726_v46 = vmul.f32 %v720_v44, %v720_v44  ;;  %v725_v47 = vmul.f32 0.03125, %v724_v45  ;;  %v728_v51 = vsub.f32 %v713_v38, %v720_v44  ;;  %v898_v38 = vld [vmem:[#allocation4 + $0x170] sm:$0xff] }
 0x5e5   :  { %v2530_v39 = vpack.c.bf16 %v898_v38, %v897_v36  ;;  %v902_v44 = vld [vmem:[#allocation4 + $0x190] sm:$0xff] }
 0x5e6   :  { %v727_v48 = vsub.f32 %v725_v47, %v726_v46  ;;  %v2536_v45 = vpack.c.bf16 %v902_v44, %v901_v43  ;;  %v1046_v43 = vld [vmem:[#allocation4 + $0x1b8] sm:$0xff] }
 0x5e7   :  { %v2542_v44 = vpack.c.bf16 %v1046_v43, %v1045_v41 }
 0x5e8   :  { %v729_v50 = vadd.f32 1e-05, %v727_v48 }
 0x5ea   :  { %2621 = vrsqrt.f32 %v729_v50 }
 0x5f4   :  { %v2622_v52 = vpop.eup %2621 }
 0x5f5   :  { %v731_v54 = vmul.f32 %v2622_v52, %v728_v51 }
 0x5f7   :  { %v737_v58 = vmul.f32 %v2167_v53, %v731_v54 }
 0x5f9   :  { %v743_v60 = vadd.f32 %v2168_v55, %v737_v58  ;;  %v2174_v58 = vld [vmem:[#allocation4 + $0x151] ss:$0 sm:$0xff] }
 0x5fb   :  { %v744_v61 = vadd.f32 %v743_v60, %v2816_v59 }
 0x5fd   :  { %v745_v62 = vsel %vm46_vm1, %v744_v61, 0.0  ;;  %v749_v63 = vmul.f32 %v744_v61, %v744_v61 }
 0x5fe   :  { %746 = vadd.xlane.f32.xlu1 %v745_v62 }
 0x5ff   :  { %v750_v2 = vsel %vm46_vm1, %v749_v63, 0.0 }
 0x600   :  { %751 = vadd.xlane.f32.xlu0 %v750_v2 }
 0x68b   :  { %v747_v59 = vpop.xlane.xlu1 %746 }
 0x68c   :  { %v748_v9 = vmul.f32 0.03125, %v747_v59 }
 0x68d   :  { %v752_v10 = vpop.xlane.xlu0 %751 }
 0x68e   :  { %v754_v11 = vmul.f32 %v748_v9, %v748_v9  ;;  %v753_v12 = vmul.f32 0.03125, %v752_v10  ;;  %v756_v15 = vsub.f32 %v744_v61, %v748_v9  ;;  %v2175_v61 = vld [vmem:[#allocation4 + $0x152] ss:$0 sm:$0xff] }
 0x690   :  { %v755_v13 = vsub.f32 %v753_v12, %v754_v11 }
 0x692   :  { %v757_v14 = vadd.f32 1e-05, %v755_v13  ;;  %v461_v13 = vld [vmem:[#allocation4 + $0x38] sm:$0x3] }
 0x694   :  { %2623 = vrsqrt.f32 %v757_v14 }
 0x69e   :  { %v2624_v16 = vpop.eup %2623 }
 0x69f   :  { %v759_v18 = vmul.f32 %v2624_v16, %v756_v15 }
 0x6a1   :  { %v765_v20 = vmul.f32 %v2169_v17, %v759_v18 }
 0x6a3   :  { %v771_v21 = vadd.f32 %v2170_v19, %v765_v20 }
 0x6a5   :  { %v2171_v22 = vmul.f32 -1.442695, %v771_v21 }
 0x6a7   :  { %2625 = vpow2.f32 %v2171_v22 }
 0x6b1   :  { %v2626_v23 = vpop.eup %2625 }
 0x6b2   :  { %v775_v24 = vadd.f32 1.0, %v2626_v23 }
 0x6b4   :  { %2627 = vrcp.f32 %v775_v24 }
 0x6be   :  { %v2628_v25 = vpop.eup %2627 }
 0x6bf   :  { %v2838_v26 = vmul.f32 %v2628_v25, %v771_v21 }
 0x6c1   :  { %2391 = vmatmul.mubr.msk.f32.vlgmr.msra.gmra.mrb[4].mxu0 %vm46_vm1, %v2838_v26 }
 0x6c2   :  { %2409 = vmatprep.mubr.msk.f32.mxu0 %vm2720_vm0, %v2721_v1  ;;  %2528 = vmatpush3.bf16.msra.mxu0 %v2527_v37 }
 0x6c3   :  { %2529 = vmatprep.subr.bf16.mxu0 %v2719_v0 }
 0x6c6   :  { %2531 = vmatpush3.bf16.msra.mxu0 %v2530_v39 }
 0x6c7   :  { %2532 = vmatprep.subr.bf16.mxu0 %v2719_v0 }
 0x6ca   :  { %2534 = vmatpush3.bf16.msra.mxu0 %v2533_v42 }
 0x6cb   :  { %2535 = vmatprep.subr.bf16.mxu0 %v2719_v0 }
 0x6ce   :  { %2537 = vmatpush3.bf16.msra.mxu0 %v2536_v45 }
 0x6cf   :  { %2550 = vmatprep.subr.bf16.mxu0 %v2719_v0 }
 0x794   :  { %v857_v28 = vpop.f32.mrb[4].mxu0 }
 0x795   :  { %v858_v29 = vadd.f32 %v2172_v27, %v857_v28  ;;  %v2392_v30 = vpop.f32.mrb[5].mxu0  ;;  %v2179_v27 = vld [vmem:[#allocation4 + $0x199] ss:$0 sm:$0xff] }
 0x797   :  { %v861_v31 = vsel %vm56_vm2, %v858_v29, 0.0  ;;  %v865_v32 = vmul.f32 %v858_v29, %v858_v29 }
 0x798   :  { %862 = vadd.xlane.f32.xlu1 %v861_v31  ;;  %v2180_v31 = vld [vmem:[#allocation4 + $0x19a] ss:$0 sm:$0xff] }
 0x799   :  { %v866_v33 = vsel %vm56_vm2, %v865_v32, 0.0 }
 0x79a   :  { %867 = vadd.xlane.f32.xlu0 %v866_v33 }
 0x825   :  { %v863_v46 = vpop.xlane.xlu1 %862 }
 0x826   :  { %v864_v47 = vmul.f32 0.015625, %v863_v46 }
 0x827   :  { %v868_v48 = vpop.xlane.xlu0 %867 }
 0x828   :  { %v870_v50 = vmul.f32 %v864_v47, %v864_v47  ;;  %v869_v51 = vmul.f32 0.015625, %v868_v48  ;;  %v872_v54 = vsub.f32 %v858_v29, %v864_v47 }
 0x82a   :  { %v871_v52 = vsub.f32 %v869_v51, %v870_v50 }
 0x82c   :  { %v873_v53 = vadd.f32 1e-05, %v871_v52 }
 0x82e   :  { %2629 = vrsqrt.f32 %v873_v53 }
 0x838   :  { %v2630_v55 = vpop.eup %2629 }
 0x839   :  { %v875_v60 = vmul.f32 %v2630_v55, %v872_v54  ;;  %v2181_v55 = vld [vmem:[#allocation4 + $0x19b] ss:$0 sm:$0xff] }
 0x83b   :  { %v881_v62 = vmul.f32 %v2174_v58, %v875_v60  ;;  %v2182_v60 = vld [vmem:[#allocation4 + $0x19c] ss:$0 sm:$0xff] }
 0x83d   :  { %v887_v63 = vadd.f32 %v2175_v61, %v881_v62 }
 0x83f   :  { %v2176_v2 = vmul.f32 -1.442695, %v887_v63 }
 0x841   :  { %2631 = vpow2.f32 %v2176_v2 }
 0x84b   :  { %v2632_v3 = vpop.eup %2631 }
 0x84c   :  { %v891_v4 = vadd.f32 1.0, %v2632_v3 }
 0x84e   :  { %2633 = vrcp.f32 %v891_v4  ;;  %v1125_v4 = vld [vmem:[#allocation4 + $0x1c8] sm:$0xff] }
 0x858   :  { %v2634_v5 = vpop.eup %2633 }
 0x859   :  { %v894_v6 = vmul.f32 %v2634_v5, %v887_v63  ;;  %v1126_v5 = vld [vmem:[#allocation4 + $0x1d0] sm:$0xff] }
 0x85b   :  { %2410 = vmatmul.mubr.msk.f32.vlgmr.msra.gmra.mrb[6].mxu0 %vm56_vm2, %v894_v6 }
 0x85c   :  { %2442 = vmatprep.mubr.msk.f32.mxu0 %vm2720_vm0, %v2721_v1 }
 0x92e   :  { %v977_v8 = vpop.f32.mrb[6].mxu0 }
 0x92f   :  { %v978_v59 = vadd.f32 %v2177_v7, %v977_v8  ;;  %v2411_v9 = vpop.f32.mrb[7].mxu0  ;;  %v2545_v7 = vpack.c.bf16 %v1126_v5, %v1125_v4 }
 0x930   :  { %v1128_v9 = vld [vmem:[#allocation4 + $0x1e0] sm:$0xff] }
 0x931   :  { %v981_v10 = vsel %vm46_vm1, %v978_v59, 0.0  ;;  %v985_v11 = vmul.f32 %v978_v59, %v978_v59 }
 0x932   :  { %982 = vadd.xlane.f32.xlu1 %v981_v10 }
 0x933   :  { %v986_v12 = vsel %vm46_vm1, %v985_v11, 0.0  ;;  %v1296_v11 = vld [vmem:[#allocation4 + $0x218] sm:$0xff] }
 0x934   :  { %987 = vadd.xlane.f32.xlu0 %v986_v12  ;;  %v1297_v12 = vld [vmem:[#allocation4 + $0x220] sm:$0xff] }
 0x943   :  { %469 = vperm.xlu1 %2610, %v461_v13  }
 0x9bf   :  { %v983_v14 = vpop.xlane.xlu1 %982 }
 0x9c0   :  { %v984_v15 = vmul.f32 0.03125, %v983_v14  ;;  %v2557_v14 = vpack.c.bf16 %v1297_v12, %v1296_v11 }
 0x9c1   :  { %v988_v16 = vpop.xlane.xlu0 %987 }
 0x9c2   :  { %v990_v17 = vmul.f32 %v984_v15, %v984_v15  ;;  %v989_v18 = vmul.f32 0.03125, %v988_v16  ;;  %v992_v24 = vsub.f32 %v978_v59, %v984_v15  ;;  %v1127_v59 = vld [vmem:[#allocation4 + $0x1d8] sm:$0xff]  ;;  %v1298_v15 = vld [vmem:[#allocation4 + $0x228] sm:$0xff]  ;;  %v1299_v16 = vld [vmem:[#allocation4 + $0x230] sm:$0xff] }
 0x9c3   :  { %v470_v19 = vpop.permute.xlu1 %469  ;;  %v2548_v10 = vpack.c.bf16 %v1128_v9, %v1127_v59 }
 0x9c4   :  { %v991_v20 = vsub.f32 %v989_v18, %v990_v17  ;;  %v473_v21 = vadd.f32 %v2806_v49, %v470_v19  ;;  %v2560_v18 = vpack.c.bf16 %v1299_v16, %v1298_v15  ;;  %v1468_v19 = vld [vmem:[#allocation4 + $0x268] sm:$0xff] }
 0x9c6   :  { %v993_v22 = vadd.f32 1e-05, %v991_v20  ;;  %v2159_v23 = vmul.f32 -1.442695, %v473_v21  ;;  %v1469_v20 = vld [vmem:[#allocation4 + $0x270] sm:$0xff] }
 0x9c8   :  { %2635 = vrsqrt.f32 %v993_v22  ;;  %v2569_v22 = vpack.c.bf16 %v1469_v20, %v1468_v19 }
 0x9c9   :  { %2637 = vpow2.f32 %v2159_v23  ;;  %v1471_v23 = vld [vmem:[#allocation4 + $0x280] sm:$0xff] }
 0x9d2   :  { %v2636_v25 = vpop.eup %2635 }
 0x9d3   :  { %v2638_v28 = vpop.eup %2637  ;;  %v995_v29 = vmul.f32 %v2636_v25, %v992_v24 }
 0x9d4   :  { %v481_v30 = vadd.f32 1.0, %v2638_v28 }
 0x9d5   :  { %v1001_v32 = vmul.f32 %v2179_v27, %v995_v29  ;;  %v1214_v29 = vld [vmem:[#allocation4 + $0x1f0] sm:$0xff] }
 0x9d6   :  { %2639 = vrcp.f32 %v481_v30  ;;  %v1215_v30 = vld [vmem:[#allocation4 + $0x1f8] sm:$0xff] }
 0x9d7   :  { %v1007_v33 = vadd.f32 %v2180_v31, %v1001_v32  ;;  %v2551_v31 = vpack.c.bf16 %v1215_v30, %v1214_v29  ;;  %v1216_v32 = vld [vmem:[#allocation4 + $0x200] sm:$0xff]  ;;  %v2727_v29 = vmov 2475754826  }
 0x9d9   :  { %v1008_v34 = vadd.f32 %v1007_v33, %v2838_v26  ;;  %v1043_v26 = vld [vmem:[#allocation4 + $0x1a0] sm:$0xff]  ;;  %2552 = vmatpush3.bf16.msra.mxu0 %v2551_v31  ;;  %v1217_v33 = vld [vmem:[#allocation4 + $0x208] sm:$0xff] }
 0x9da   :  { %v2539_v42 = vpack.c.bf16 %v1044_v40, %v1043_v26  ;;  %2553 = vmatprep.subr.bf16.mxu0 %v2719_v0  ;;  %v2191_v40 = vld [vmem:[#allocation4 + $0x238] ss:$0 sm:$0xff] }
 0x9db   :  { %v1009_v35 = vsel %vm46_vm1, %v1008_v34, 0.0  ;;  %v1013_v36 = vmul.f32 %v1008_v34, %v1008_v34 }
 0x9dc   :  { %1010 = vadd.xlane.f32.xlu0 %v1009_v35  ;;  %2540 = vmatpush3.bf16.msra.mxu1 %v2539_v42 }
 0x9dd   :  { %v1014_v49 = vsel %vm46_vm1, %v1013_v36, 0.0  ;;  %2541 = vmatprep.subr.bf16.mxu1 %v2719_v0 }
 0x9e0   :  { %v2640_v37 = vpop.eup %2639  ;;  %1015 = vadd.xlane.f32.xlu0 %v1014_v49  ;;  %2543 = vmatpush3.bf16.msra.mxu1 %v2542_v44  ;;  %v2186_v49 = vld [vmem:[#allocation4 + $0x1e8] ss:$0 sm:$0xff] }
 0x9e1   :  { %v2859_v38 = vmul.f32 %v2640_v37, %v473_v21  ;;  %2544 = vmatprep.subr.bf16.mxu1 %v2719_v0 }
 0x9e3   :  { %v501_v39 = vrot.slane %v2859_v38, 7  ;;  %v507_v27 = vrot.slane %v2859_v38, 1 }
 0x9e5   :  { %502 = vrot.lane.b32.xlu1 %v501_v39, %s2724_s6 }
 0x9e9   :  { %509 = vrot.lane.b32.xlu1 %v2859_v38, %s2724_s6 }
 0x9f6   :  { %496 = vrot.lane.b32.xlu0 %v2808_v56, %s2724_s6  ;;  %v1470_v56 = vld [vmem:[#allocation4 + $0x278] sm:$0xff] }
 0x9f7   :  { %v2572_v24 = vpack.c.bf16 %v1471_v23, %v1470_v56 }
 0xa57   :  { %v503_v21 = vpop.permute.xlu1 %502 }
 0xa5b   :  { %v510_v25 = vpop.permute.xlu1 %509 }
 0xa5c   :  { %v512_v28 = vsel %vm505_vm5, %v507_v27, %v510_v25  ;;  %v2726_v27 = vmov 683565275  }
 0xa69   :  { %v1011_v45 = vpop.xlane.xlu0 %1010 }
 0xa6a   :  { %v1012_v46 = vmul.f32 0.03125, %v1011_v45  ;;  %v2196_v45 = vld [vmem:[#allocation4 + $0x288] ss:$0 sm:$0xff] }
 0xa6c   :  { %v1018_v48 = vmul.f32 %v1012_v46, %v1012_v46  ;;  %v1020_v53 = vsub.f32 %v1008_v34, %v1012_v46  ;;  %v2554_v34 = vpack.c.bf16 %v1217_v33, %v1216_v32  ;;  %v2728_v32 = vmov 2131351028  }
 0xa6d   :  { %v1016_v47 = vpop.xlane.xlu0 %1015 }
 0xa6e   :  { %v1017_v50 = vmul.f32 0.03125, %v1016_v47  ;;  %2555 = vmatpush3.bf16.msra.mxu0 %v2554_v34 }
 0xa6f   :  { %2562 = vmatprep.subr.bf16.mxu0 %v2719_v0 }
 0xa70   :  { %v1019_v51 = vsub.f32 %v1017_v50, %v1018_v48 }
 0xa71   :  { %v497_v13 = vpop.permute.xlu0 %496 }
 0xa72   :  { %v1021_v52 = vadd.f32 1e-05, %v1019_v51  ;;  %v499_v17 = vsel %vm493_vm4, %v489_v57, %v497_v13  ;;  %v506_v57 = vsel %vm505_vm5, %v2859_v38, %v503_v21 }
 0xa74   :  { %2641 = vrsqrt.f32 %v1021_v52 }
 0xa7e   :  { %v2642_v54 = vpop.eup %2641 }
 0xa7f   :  { %v1023_v58 = vmul.f32 %v2642_v54, %v1020_v53  ;;  %v1385_v54 = vld [vmem:[#allocation4 + $0x240] sm:$0xff] }
 0xa81   :  { %v1029_v61 = vmul.f32 %v2181_v55, %v1023_v58  ;;  %v1386_v55 = vld [vmem:[#allocation4 + $0x248] sm:$0xff] }
 0xa83   :  { %v1035_v62 = vadd.f32 %v2182_v60, %v1029_v61  ;;  %v2563_v60 = vpack.c.bf16 %v1386_v55, %v1385_v54 }
 0xa85   :  { %v2183_v63 = vmul.f32 -1.442695, %v1035_v62 }
 0xa87   :  { %2643 = vpow2.f32 %v2183_v63  ;;  %v1388_v63 = vld [vmem:[#allocation4 + $0x258] sm:$0xff] }
 0xa91   :  { %v2644_v2 = vpop.eup %2643 }
 0xa92   :  { %v1039_v3 = vadd.f32 1.0, %v2644_v2 }
 0xa94   :  { %2645 = vrcp.f32 %v1039_v3 }
 0xa9e   :  { %v2646_v6 = vpop.eup %2645 }
 0xa9f   :  { %v1042_v8 = vmul.f32 %v2646_v6, %v1035_v62  ;;  %v1387_v62 = vld [vmem:[#allocation4 + $0x250] sm:$0xff] }
 0xaa0   :  { %v2566_v2 = vpack.c.bf16 %v1388_v63, %v1387_v62 }
 0xaa1   :  { %2421 = vmatmul.mubr.msk.f32.vlgmr.msra.gmra.mrb[6].mxu1 %vm46_vm1, %v1042_v8  ;;  %v2194_v8 = vld [vmem:[#allocation4 + $0x260] ss:$0 sm:$0xff] }
 0xaa2   :  { %2546 = vmatpush3.bf16.msra.mxu1 %v2545_v7  ;;  %2431 = vmatprep.mubr.msk.f32.mxu1 %vm2720_vm0, %v2721_v1  ;;  %v1556_v7 = vlaneseq }
 0xaa3   :  { %2547 = vmatprep.subr.bf16.mxu1 %v2719_v0 }
 0xaa4   :  { %v1557_v59 = vshrl.u32 %v1556_v7, 7 }
 0xaa6   :  { %2549 = vmatpush3.bf16.msra.mxu1 %v2548_v10  ;;  %v1558_v12 = vsub.s32 0, %v1557_v59  ;;  %v1562_v13 = vsub.s32 1, %v1557_v59 }
 0xaa7   :  { %2556 = vmatprep.subr.bf16.mxu1 %v2719_v0 }
 0xaa9   :  { %2432 = vmatmul.mubr.msk.f32.vlgmr.msra.gmra.mrb[8].mxu1 %vm46_vm1, %v499_v17 }
 0xaaa   :  { %2558 = vmatpush3.bf16.msra.mxu1 %v2557_v14  ;;  %2453 = vmatprep.mubr.msk.f32.mxu1 %vm2720_vm0, %v2721_v1 }
 0xaab   :  { %2559 = vmatprep.subr.bf16.mxu1 %v2719_v0 }
 0xaae   :  { %2561 = vmatpush3.bf16.msra.mxu1 %v2560_v18 }
 0xaaf   :  { %2568 = vmatprep.subr.bf16.mxu1 %v2719_v0 }
 0xab1   :  { %2454 = vmatmul.mubr.msk.f32.vlgmr.msra.gmra.mrb[10].mxu1 %vm46_vm1, %v506_v57 }
 0xab2   :  { %2570 = vmatpush3.bf16.msra.mxu1 %v2569_v22  ;;  %2475 = vmatprep.mubr.msk.f32.mxu1 %vm2720_vm0, %v2721_v1 }
 0xab3   :  { %2571 = vmatprep.subr.bf16.mxu1 %v2719_v0 }
 0xab6   :  { %2573 = vmatpush3.bf16.msra.mxu1 %v2572_v24 }
 0xab9   :  { %2476 = vmatmul.mubr.msk.f32.vlgmr.msra.gmra.mrb[12].mxu1 %vm46_vm1, %v512_v28 }
 0xb74   :  { %v2893_v35 = vpop.f32.mrb[6].mxu1 }
 0xb75   :  { %v2422_v36 = vpop.f32.mrb[7].mxu1 }
 0xb76   :  { %v2729_v36 = vmov 2102212464  }
 0xb7c   :  { %v1203_v37 = vpop.f32.mrb[8].mxu1 }
 0xb7d   :  { %v1204_v38 = vadd.f32 %v2186_v49, %v1203_v37  ;;  %v2433_v39 = vpop.f32.mrb[9].mxu1 }
 0xb7f   :  { %v2188_v26 = vmul.f32 -1.442695, %v1204_v38 }
 0xb81   :  { %2647 = vpow2.f32 %v2188_v26 }
 0xb84   :  { %v1374_v41 = vpop.f32.mrb[10].mxu1 }
 0xb85   :  { %v1375_v42 = vadd.f32 %v2191_v40, %v1374_v41  ;;  %v2455_v43 = vpop.f32.mrb[11].mxu1  ;;  %v2731_v40 = vmov 1326507024  }
 0xb87   :  { %v2193_v44 = vmul.f32 -1.442695, %v1375_v42 }
 0xb89   :  { %2649 = vpow2.f32 %v2193_v44 }
 0xb8b   :  { %v2648_v46 = vpop.eup %2647 }
 0xb8c   :  { %v1210_v47 = vadd.f32 1.0, %v2648_v46  ;;  %v1546_v48 = vpop.f32.mrb[12].mxu1 }
 0xb8d   :  { %v1547_v50 = vadd.f32 %v2196_v45, %v1546_v48  ;;  %v2477_v51 = vpop.f32.mrb[13].mxu1 }
 0xb8e   :  { %2651 = vrcp.f32 %v1210_v47 }
 0xb8f   :  { %1551 = vrot.lane.b32.xlu1 %v1547_v50, %s2725_s7 }
 0xb93   :  { %v2650_v52 = vpop.eup %2649 }
 0xb94   :  { %v1381_v53 = vadd.f32 1.0, %v2650_v52 }
 0xb96   :  { %2653 = vrcp.f32 %v1381_v53 }
 0xb98   :  { %v2652_v58 = vpop.eup %2651 }
 0xb99   :  { %v1213_v61 = vmul.f32 %v2652_v58, %v1204_v38  ;;  %v2730_v38 = vmov 920167782  }
 0xb9b   :  { %2443 = vmatmul.mubr.msk.f32.vlgmr.msra.gmra.mrb[8].mxu0 %vm46_vm1, %v1213_v61 }
 0xb9c   :  { %2564 = vmatpush3.bf16.msra.mxu0 %v2563_v60  ;;  %2464 = vmatprep.mubr.msk.f32.mxu0 %vm2720_vm0, %v2721_v1 }
 0xb9d   :  { %2565 = vmatprep.subr.bf16.mxu0 %v2719_v0 }
 0xba0   :  { %v2654_v3 = vpop.eup %2653  ;;  %2567 = vmatpush3.bf16.msra.mxu0 %v2566_v2 }
 0xba1   :  { %v1384_v4 = vmul.f32 %v2654_v3, %v1375_v42 }
 0xba3   :  { %2465 = vmatmul.mubr.msk.f32.vlgmr.msra.gmra.mrb[10].mxu0 %vm46_vm1, %v1384_v4 }
 0xc01   :  { %v1552_v14 = vpop.permute.xlu1 %1551 }
 0xc6e   :  { %v2901_v5 = vpop.f32.mrb[8].mxu0 }
 0xc6f   :  { %v2444_v6 = vpop.f32.mrb[9].mxu0 }
 0xc76   :  { %v1463_v9 = vpop.f32.mrb[10].mxu0 }
 0xc77   :  { %v1464_v10 = vadd.f32 %v2194_v8, %v1463_v9  ;;  %v2466_v11 = vpop.f32.mrb[11].mxu0 }
 0xc79   :  { %v1467_v1 = vmax.f32 %v1464_v10, 0.0 }
 0xc7b   :  { %v1555_v0 = vsel %vm1554_vm6, %v1467_v1, %v1552_v14 }
 0xc7c   :  { %v1559_v15 = vrot.slane %v1555_v0, %v1558_v12  ;;  %v1563_v16 = vrot.slane %v1555_v0, %v1562_v13 }
 0xc7e   :  { %v2905_v17 = vsel %vm493_vm4, %v1559_v15, %v1563_v16 }
 0xc7f   :  { %v1568_v18 = vand.u32 2139095040, %v2905_v17  ;;  %v1565_v22 = vand.u32 2147483647, %v2905_v17  ;;  %vm1567_vm14 = vcmp.lt.s32.totalorder %v2905_v17, 0 }
 0xc81   :  { %v1569_v19 = vshrl.u32 %v1568_v18, 23  ;;  %v1572_v24 = vand.u32 8388607, %v1565_v22  ;;  %vm1566_vm15 = vcmp.le.f32.partialorder %v1565_v22, 0.7853982 }
 0xc83   :  { %v2198_v20 = vadd.s32 4294967169, %v1569_v19  ;;  %v1573_v42 = vor.u32 8388608, %v1572_v24 }
 0xc85   :  { %v1575_v21 = vadd.s32 1, %v2198_v20  ;;  %v1613_v60 = vshll.u32 %v1573_v42, 8 }
 0xc87   :  { %vm1576_vm7 = vcmp.gt.s32.totalorder %v1575_v21, 0 }
 0xc88   :  { %v1577_v56 = vsel %vm1576_vm7, %v1575_v21, 0  ;;  %vm1657_vm7 = vweird.f32 %v2905_v17 }
 0xc89   :  { %v1579_v23 = vand.u32 31, %v1577_v56  ;;  %v1578_v25 = vshrl.u32 %v1577_v56, 5 }
 0xc8b   :  { %v1580_v57 = vsub.s32 32, %v1579_v23  ;;  %v1582_v28 = vshll.u32 %v2726_v27, %v1579_v23  ;;  %v1585_v30 = vshll.u32 %v2727_v29, %v1579_v23  ;;  %v1588_v34 = vshll.u32 %v2728_v32, %v1579_v23 }
 0xc8c   :  { %v1591_v37 = vshll.u32 %v2729_v36, %v1579_v23  ;;  %v1594_v26 = vshll.u32 %v2730_v38, %v1579_v23  ;;  %vm1597_vm8 = vcmp.lt.s32.totalorder %v1578_v25, 1  ;;  %vm1600_vm9 = vcmp.lt.s32.totalorder %v1578_v25, 4 }
 0xc8d   :  { %v1583_v31 = vshrl.u32 %v2727_v29, %v1580_v57  ;;  %v1586_v33 = vshrl.u32 %v2728_v32, %v1580_v57  ;;  %v1589_v49 = vshrl.u32 %v2729_v36, %v1580_v57  ;;  %v1592_v39 = vshrl.u32 %v2730_v38, %v1580_v57 }
 0xc8e   :  { %v1595_v41 = vshrl.u32 %v2731_v40, %v1580_v57  ;;  %v1581_v52 = vshrl.u32 %v2726_v27, %v1580_v57  ;;  %vm1599_vm10 = vcmp.lt.s32.totalorder %v1578_v25, 3  ;;  %vm1598_vm11 = vcmp.lt.s32.totalorder %v1578_v25, 2 }
 0xc8f   :  { %v1584_v43 = vor.u32 %v1583_v31, %v1582_v28  ;;  %v1587_v44 = vor.u32 %v1586_v33, %v1585_v30  ;;  %v1590_v45 = vor.u32 %v1589_v49, %v1588_v34  ;;  %v1593_v46 = vor.u32 %v1592_v39, %v1591_v37 }
 0xc90   :  { %v1596_v47 = vor.u32 %v1595_v41, %v1594_v26 }
 0xc91   :  { %v1602_v48 = vsel %vm1600_vm9, %v1590_v45, 2102212464  ;;  %v1605_v50 = vsel %vm1597_vm8, %v1584_v43, %v1587_v44  ;;  %v1609_v51 = vsel %vm1597_vm8, %v1587_v44, %v1590_v45  ;;  %v1606_v53 = vsel %vm1600_vm9, %v1593_v46, 920167782 }
 0xc92   :  { %v1610_v54 = vsel %vm1600_vm9, %v1596_v47, 1326507024  ;;  %v1607_v55 = vsel %vm1599_vm10, %v1590_v45, %v1606_v53  ;;  %v1601_v61 = vsel %vm1597_vm8, %v1581_v52, %v1584_v43  ;;  %v1603_v62 = vsel %vm1599_vm10, %v1587_v44, %v1602_v48 }
 0xc93   :  { %v1611_v58 = vsel %vm1599_vm10, %v1593_v46, %v1610_v54  ;;  %v1608_v63 = vsel %vm1598_vm11, %v1605_v50, %v1607_v55  ;;  %v1604_v8 = vsel %vm1598_vm11, %v1601_v61, %v1603_v62  ;;  %v2189_v50 = vld [vmem:[#allocation4 + $0x210] ss:$0 sm:$0xff] }
 0xc94   :  { %v1612_v2 = vsel %vm1598_vm11, %v1609_v51, %v1611_v58  ;;  %v2925_v6 = vmul.u32.u64.low %v1613_v60, %v1608_v63  ;;  %v2926_v7 = vmul.u32.u64.high %v1613_v60, %v1608_v63, %v2925_v6  ;;  %v1620_v9 = vmul.u32 %v1613_v60, %v1604_v8 }
 0xc95   :  { %v2922_v3 = vmul.u32.u64.low %v1613_v60, %v1612_v2  ;;  %v2923_v4 = vmul.u32.u64.high %v1613_v60, %v1612_v2, %v2922_v3  ;;  %v2937_v55 = vadd.f32 %v2189_v50, %v2901_v5  ;;  %vm1791_vm11 = vcmask 15360  }
 0xc96   :  { %v1623_v59 = vadd.s32 1, %v2926_v7 }
 0xc97   :  { %vm1622_vm12 = vc.u32 %v2923_v4, %v2925_v6  ;;  %v1621_v20 = vadd.s32 %v2925_v6, %v2923_v4  ;;  %v1799_v63 = vmul.f32 %v2937_v55, %v2937_v55 }
 0xc98   :  { %v1624_v10 = vsel %vm1622_vm12, %v1623_v59, %v2926_v7 }
 0xc99   :  { %v1625_v11 = vadd.s32 %v1624_v10, %v1620_v9 }
 0xc9b   :  { %v1626_v12 = vadd.s32 536870912, %v1625_v11 }
 0xc9d   :  { %v1627_v13 = vshrl.u32 %v1626_v12, 30 }
 0xc9f   :  { %v1628_v1 = vshll.u32 %v1627_v13, 30  ;;  %v1651_v49 = vsub.s32 4, %v1627_v13 }
 0xca1   :  { %v1629_v14 = vsub.s32 %v1625_v11, %v1628_v1  ;;  %v1652_v26 = vsel %vm1567_vm14, %v1651_v49, %v1627_v13 }
 0xca2   :  { %v1654_v42 = vsel %vm1566_vm15, 0, %v1652_v26 }
 0xca3   :  { %v1631_v0 = vsub.s32 0, %v1629_v14  ;;  %v1658_v43 = vadd.s32 3, %v1654_v42  ;;  %v1762_v44 = vand.u32 3, %v1654_v42 }
 0xca5   :  { %v2199_v15 = vmin.u32 %v1631_v0, %v1629_v14  ;;  %v1659_v45 = vand.u32 3, %v1658_v43  ;;  %vm1767_vm0 = vcmp.eq.s32.totalorder %v1762_v44, 2  ;;  %vm1764_vm2 = vcmp.eq.s32.totalorder %v1762_v44, 0 }
 0xca6   :  { %vm1763_vm4 = vcmp.lt.s32.totalorder %v1762_v44, 2 }
 0xca7   :  { %v1633_v16 = vclz %v2199_v15  ;;  %vm1664_vm1 = vcmp.eq.s32.totalorder %v1659_v45, 2  ;;  %vm1661_vm3 = vcmp.eq.s32.totalorder %v1659_v45, 0  ;;  %vm1660_vm5 = vcmp.lt.s32.totalorder %v1659_v45, 2 }
 0xca9   :  { %v2200_v18 = vadd.s32 4294967294, %v1633_v16 }
 0xcab   :  { %vm2201_vm13 = vcmp.lt.s32.totalorder %v2200_v18, 0 }
 0xcac   :  { %v1636_v19 = vsel %vm2201_vm13, 0, %v2200_v18 }
 0xcad   :  { %v1637_v21 = vsub.s32 32, %v1636_v19  ;;  %v1641_v56 = vsub.s32 4294967266, %v1636_v19  ;;  %v1638_v23 = vshll.u32 %v1629_v14, %v1636_v19 }
 0xcaf   :  { %v1639_v57 = vshrl.u32 %v1621_v20, %v1637_v21  ;;  %v1642_v24 = vadd.s32 127, %v1641_v56 }
 0xcb1   :  { %v1640_v25 = vor.u32 %v1639_v57, %v1638_v23  ;;  %v1643_v28 = vshll.u32 %v1642_v24, 23 }
 0xcb3   :  { %v1644_v30 = vor.u32 4788187, %v1643_v28  ;;  %v1647_v33 = vcvt.s32.f32 %v1640_v25 }
 0xcb5   :  { %v1645_v31 = vand.u32 2147483647, %v1644_v30 }
 0xcb7   :  { %v1648_v34 = vmul.f32 %v1647_v33, %v1645_v31 }
 0xcb9   :  { %v1649_v37 = vxor.u32 2147483648, %v1648_v34 }
 0xcbb   :  { %v1650_v39 = vsel %vm1567_vm14, %v1649_v37, %v1648_v34 }
 0xcbc   :  { %v1653_v41 = vsel %vm1566_vm15, %v2905_v17, %v1650_v39 }
 0xcbd   :  { %2655 = vcosq.f32 %v1653_v41 }
 0xcbe   :  { %2657 = vsinq.f32 %v1653_v41 }
 0xcc7   :  { %v2656_v46 = vpop.eup %2655 }
 0xcc8   :  { %v2658_v47 = vpop.eup %2657  ;;  %v1665_v48 = vxor.u32 2147483648, %v2656_v46 }
 0xcc9   :  { %v1662_v51 = vxor.u32 2147483648, %v2658_v47 }
 0xcca   :  { %v1769_v52 = vsel %vm1767_vm0, %v1665_v48, %v2658_v47  ;;  %v1666_v22 = vsel %vm1664_vm1, %v1665_v48, %v2658_v47 }
 0xccb   :  { %v1766_v53 = vsel %vm1764_vm2, %v2656_v46, %v1662_v51  ;;  %v1663_v54 = vsel %vm1661_vm3, %v2656_v46, %v1662_v51 }
 0xccc   :  { %v1770_v58 = vsel %vm1763_vm4, %v1766_v53, %v1769_v52  ;;  %v1667_v60 = vsel %vm1660_vm5, %v1663_v54, %v1666_v22 }
 0xccd   :  { %v1771_v61 = vsel %vm1657_vm7, nan, %v1770_v58  ;;  %v1668_v62 = vsel %vm1657_vm7, nan, %v1667_v60 }
 0xcce   :  { %1773 = vrot.lane.b32.xlu1 %v1771_v61, %s2725_s7  ;;  %1778 = vrot.lane.b32.xlu0 %v1668_v62, %s2725_s7 }
 0xcd2   :  { %1801 = vrot.lane.b32.xlu1 %v1799_v63, %s2732_s8  ;;  %1805 = vrot.lane.b32.xlu0 %v1799_v63, %s2733_s9 }
 0xcd6   :  { %1795 = vperm.xlu1 %2610, %v2905_v17  }
 0xd40   :  { %v1774_v5 = vpop.permute.xlu1 %1773  ;;  %v1779_v2 = vpop.permute.xlu0 %1778 }
 0xd41   :  { %v1776_v3 = vmul.f32 %v1774_v5, %v1668_v62  ;;  %v1781_v4 = vmul.f32 %v1779_v2, %v1668_v62 }
 0xd43   :  { %1787 = vrot.lane.b32.xlu1 %v1781_v4, %s2732_s8  ;;  %1783 = vrot.lane.b32.xlu0 %v1776_v3, %s2733_s9 }
 0xd44   :  { %v1802_v6 = vpop.permute.xlu1 %1801  ;;  %v1806_v8 = vpop.permute.xlu0 %1805 }
 0xd45   :  { %v1804_v7 = vadd.f32 %v1802_v6, %v1799_v63 }
 0xd47   :  { %v1808_v59 = vadd.f32 %v1806_v8, %v1804_v7 }
 0xd49   :  { %2659 = vrsqrt.f32 %v1808_v59  ;;  %vm1811_vm8 = vcmp.eq.f32.partialorder %v1808_v59, inf  ;;  %v1814_v11 = vand.u32 2147483648, %v1808_v59  ;;  %vm1813_vm9 = vcmp.eq.f32.partialorder %v1808_v59, 0.0 }
 0xd53   :  { %v2660_v9 = vpop.eup %2659 }
 0xd54   :  { %v1810_v10 = vmul.f32 %v2660_v9, %v1808_v59 }
 0xd55   :  { %v1796_v56 = vpop.permute.xlu1 %1795 }
 0xd56   :  { %v1812_v12 = vsel %vm1811_vm8, %v1808_v59, %v1810_v10 }
 0xd57   :  { %v2949_v13 = vsel %vm1813_vm9, %v1814_v11, %v1812_v12 }
 0xd58   :  { %v1816_v1 = vadd.f32 1e-06, %v2949_v13  ;;  %v1837_v0 = vand.u32 2139095040, %v2949_v13  ;;  %v1834_v24 = vand.u32 2147483647, %v2949_v13  ;;  %vm1836_vm2 = vcmp.lt.s32.totalorder %v2949_v13, 0 }
 0xd5a   :  { %2661 = vrcp.f32 %v1816_v1  ;;  %v1838_v15 = vshrl.u32 %v1837_v0, 23  ;;  %v1841_v46 = vand.u32 8388607, %v1834_v24  ;;  %vm1835_vm3 = vcmp.le.f32.partialorder %v1834_v24, 0.7853982 }
 0xd5c   :  { %v2206_v16 = vadd.s32 4294967169, %v1838_v15  ;;  %v1842_v48 = vor.u32 8388608, %v1841_v46 }
 0xd5e   :  { %v1844_v18 = vadd.s32 1, %v2206_v16  ;;  %v1882_v58 = vshll.u32 %v1842_v48, 8 }
 0xd60   :  { %vm1845_vm10 = vcmp.gt.s32.totalorder %v1844_v18, 0 }
 0xd61   :  { %v1846_v19 = vsel %vm1845_vm10, %v1844_v18, 0  ;;  %vm1926_vm10 = vweird.f32 %v2949_v13 }
 0xd62   :  { %v1848_v20 = vand.u32 31, %v1846_v19  ;;  %v1847_v25 = vshrl.u32 %v1846_v19, 5 }
 0xd64   :  { %v2952_v14 = vpop.eup %2661  ;;  %v1849_v21 = vsub.s32 32, %v1848_v20  ;;  %v1860_v28 = vshll.u32 %v2729_v36, %v1848_v20  ;;  %v1863_v37 = vshll.u32 %v2730_v38, %v1848_v20  ;;  %v1854_v42 = vshll.u32 %v2727_v29, %v1848_v20 }
 0xd65   :  { %1830 = vrot.lane.b32.xlu1 %v2952_v14, %s2734_s10  ;;  %1826 = vrot.lane.b32.xlu0 %v2952_v14, %s2725_s7  ;;  %v1857_v43 = vshll.u32 %v2728_v32, %v1848_v20  ;;  %vm1869_vm12 = vcmp.lt.s32.totalorder %v1847_v25, 4  ;;  %vm1866_vm13 = vcmp.lt.s32.totalorder %v1847_v25, 1  ;;  %vm1868_vm14 = vcmp.lt.s32.totalorder %v1847_v25, 3 }
 0xd66   :  { %v1861_v23 = vshrl.u32 %v2730_v38, %v1849_v21  ;;  %v1864_v57 = vshrl.u32 %v2731_v40, %v1849_v21  ;;  %v1852_v33 = vshrl.u32 %v2727_v29, %v1849_v21  ;;  %v1855_v34 = vshrl.u32 %v2728_v32, %v1849_v21 }
 0xd67   :  { %v1858_v49 = vshrl.u32 %v2729_v36, %v1849_v21  ;;  %v1851_v40 = vshll.u32 %v2726_v27, %v1848_v20  ;;  %vm1867_vm15 = vcmp.lt.s32.totalorder %v1847_v25, 2  ;;  %v1850_v2 = vshrl.u32 %v2726_v27, %v1849_v21 }
 0xd68   :  { %v1862_v26 = vor.u32 %v1861_v23, %v1860_v28  ;;  %v1865_v44 = vor.u32 %v1864_v57, %v1863_v37  ;;  %v1856_v47 = vor.u32 %v1855_v34, %v1854_v42 }
 0xd69   :  { %v1853_v36 = vor.u32 %v1852_v33, %v1851_v40  ;;  %v1859_v38 = vor.u32 %v1858_v49, %v1857_v43 }
 0xd6a   :  { %v1875_v29 = vsel %vm1869_vm12, %v1862_v26, 920167782  ;;  %v1879_v32 = vsel %vm1869_vm12, %v1865_v44, 1326507024 }
 0xd6b   :  { %v1874_v50 = vsel %vm1866_vm13, %v1853_v36, %v1856_v47  ;;  %v1876_v51 = vsel %vm1868_vm14, %v1859_v38, %v1875_v29  ;;  %v1878_v52 = vsel %vm1866_vm13, %v1856_v47, %v1859_v38  ;;  %v1880_v22 = vsel %vm1868_vm14, %v1862_v26, %v1879_v32 }
 0xd6c   :  { %v1877_v53 = vsel %vm1867_vm15, %v1874_v50, %v1876_v51  ;;  %v1881_v54 = vsel %vm1867_vm15, %v1878_v52, %v1880_v22  ;;  %v1871_v5 = vsel %vm1869_vm12, %v1859_v38, 2102212464  ;;  %v1870_v3 = vsel %vm1866_vm13, %v1850_v2, %v1853_v36 }
 0xd6d   :  { %v2989_v62 = vmul.u32.u64.low %v1882_v58, %v1881_v54  ;;  %v2990_v63 = vmul.u32.u64.high %v1882_v58, %v1881_v54, %v2989_v62  ;;  %v1872_v4 = vsel %vm1868_vm14, %v1856_v47, %v1871_v5  ;;  %v1825_v32 = vmul.f32 %v2952_v14, %v2937_v55 }
 0xd6e   :  { %v1873_v7 = vsel %vm1867_vm15, %v1870_v3, %v1872_v4  ;;  %vm2136_vm13 = vcmask 23552   ;;  %vm2138_vm14 = vcmask 48128   ;;  %vm2140_vm15 = vcmask 72704  }
 0xd6f   :  { %v1889_v59 = vmul.u32 %v1882_v58, %v1873_v7 }
 0xdb5   :  { %v1788_v30 = vpop.permute.xlu1 %1787  ;;  %v1784_v31 = vpop.permute.xlu0 %1783 }
 0xdb6   :  { %v1790_v39 = vsel %vm1554_vm6, %v1784_v31, %v1788_v30 }
 0xdb7   :  { %v1792_v41 = vsel %vm1791_vm11, %v1790_v39, %v1771_v61  ;;  %v2986_v60 = vmul.u32.u64.low %v1882_v58, %v1877_v53  ;;  %v2987_v61 = vmul.u32.u64.high %v1882_v58, %v1877_v53, %v2986_v60 }
 0xdb8   :  { %v2972_v45 = vmul.f32 %v1796_v56, %v1792_v41 }
 0xdb9   :  { %v1892_v6 = vadd.s32 1, %v2987_v61  ;;  %vm1891_vm0 = vc.u32 %v2990_v63, %v2986_v60  ;;  %v1890_v31 = vadd.s32 %v2986_v60, %v2990_v63 }
 0xdba   :  { %2072 = vrot.lane.b32.xlu1 %v2972_v45, %s2733_s9  ;;  %2059 = vrot.lane.b32.xlu0 %v2972_v45, %s2725_s7  ;;  %v2041_v7 = vmul.f32 %v1825_v32, %v2972_v45 }
 0xdbb   :  { %v1893_v8 = vsel %vm1891_vm0, %v1892_v6, %v2987_v61  ;;  %vm2142_vm0 = vcmask 80896  }
 0xdbc   :  { %v1894_v9 = vadd.s32 %v1893_v8, %v1889_v59 }
 0xdbe   :  { %v1895_v10 = vadd.s32 536870912, %v1894_v9 }
 0xdc0   :  { %v1896_v16 = vshrl.u32 %v1895_v10, 30 }
 0xdc2   :  { %v1897_v18 = vshll.u32 %v1896_v16, 30  ;;  %v1920_v46 = vsub.s32 4, %v1896_v16 }
 0xdc4   :  { %v1898_v19 = vsub.s32 %v1894_v9, %v1897_v18  ;;  %v1921_v36 = vsel %vm1836_vm2, %v1920_v46, %v1896_v16 }
 0xdc5   :  { %v1923_v38 = vsel %vm1835_vm3, 0, %v1921_v36 }
 0xdc6   :  { %v1900_v20 = vsub.s32 0, %v1898_v19  ;;  %v1927_v48 = vand.u32 3, %v1923_v38  ;;  %v2030_v50 = vadd.s32 3, %v1923_v38 }
 0xdc8   :  { %v2207_v21 = vmin.u32 %v1900_v20, %v1898_v19  ;;  %vm1929_vm4 = vcmp.eq.s32.totalorder %v1927_v48, 0  ;;  %vm1932_vm5 = vcmp.eq.s32.totalorder %v1927_v48, 2  ;;  %v2031_v58 = vand.u32 3, %v2030_v50 }
 0xdc9   :  { %vm1928_vm7 = vcmp.lt.s32.totalorder %v1927_v48, 2 }
 0xdca   :  { %v1902_v56 = vclz %v2207_v21  ;;  %vm2033_vm8 = vcmp.eq.s32.totalorder %v2031_v58, 0  ;;  %vm2036_vm9 = vcmp.eq.s32.totalorder %v2031_v58, 2  ;;  %vm2032_vm12 = vcmp.lt.s32.totalorder %v2031_v58, 2  ;;  %v2184_v21 = vld [vmem:[#allocation4 + $0x1c0] ss:$0 sm:$0xff] }
 0xdcc   :  { %v2208_v23 = vadd.s32 4294967294, %v1902_v56 }
 0xdce   :  { %vm2209_vm1 = vcmp.lt.s32.totalorder %v2208_v23, 0 }
 0xdcf   :  { %v1905_v57 = vsel %vm2209_vm1, 0, %v2208_v23 }
 0xdd0   :  { %v1910_v25 = vsub.s32 4294967266, %v1905_v57  ;;  %v1906_v30 = vsub.s32 32, %v1905_v57  ;;  %v1907_v49 = vshll.u32 %v1898_v19, %v1905_v57  ;;  %v1122_v57 = vadd.f32 %v2184_v21, %v2893_v35 }
 0xdd2   :  { %v1911_v28 = vadd.s32 127, %v1910_v25  ;;  %v1908_v34 = vshrl.u32 %v1890_v31, %v1906_v30 }
 0xdd4   :  { %v1912_v33 = vshll.u32 %v1911_v28, 23  ;;  %v1909_v39 = vor.u32 %v1908_v34, %v1907_v49 }
 0xdd6   :  { %v1913_v37 = vor.u32 4788187, %v1912_v33  ;;  %v1916_v26 = vcvt.s32.f32 %v1909_v39 }
 0xdd7   :  { %v1831_v11 = vpop.permute.xlu1 %1830  ;;  %v1827_v12 = vpop.permute.xlu0 %1826 }
 0xdd8   :  { %v3000_v1 = vmul.f32 %v1831_v11, %v2937_v55  ;;  %v3003_v27 = vmul.f32 %v1827_v12, %v2937_v55  ;;  %v1914_v40 = vand.u32 2147483647, %v1913_v37 }
 0xdda   :  { %v2048_v0 = vmul.f32 %v3000_v1, %v2972_v45  ;;  %v2042_v15 = vmul.f32 %v3003_v27, %v2972_v45  ;;  %v1917_v41 = vmul.f32 %v1916_v26, %v1914_v40 }
 0xddc   :  { %2050 = vrot.lane.b32.xlu1 %v2048_v0, %s2733_s9  ;;  %2044 = vrot.lane.b32.xlu0 %v2042_v15, %s2732_s8  ;;  %v1918_v42 = vxor.u32 2147483648, %v1917_v41 }
 0xdde   :  { %v1919_v43 = vsel %vm1836_vm2, %v1918_v42, %v1917_v41 }
 0xddf   :  { %v1922_v44 = vsel %vm1835_vm3, %v2949_v13, %v1919_v43 }
 0xde0   :  { %2068 = vrot.lane.b32.xlu1 %v2972_v45, %s2734_s10  ;;  %2055 = vrot.lane.b32.xlu0 %v2972_v45, %s2732_s8  ;;  %2663 = vcosq.f32 %v1922_v44 }
 0xde1   :  { %2665 = vsinq.f32 %v1922_v44 }
 0xdea   :  { %v2664_v47 = vpop.eup %2663 }
 0xdeb   :  { %v2666_v29 = vpop.eup %2665  ;;  %v1933_v53 = vxor.u32 2147483648, %v2664_v47 }
 0xdec   :  { %v1930_v22 = vxor.u32 2147483648, %v2666_v29 }
 0xded   :  { %v1934_v61 = vsel %vm1932_vm5, %v1933_v53, %v2666_v29  ;;  %v2038_v2 = vsel %vm2036_vm9, %v1933_v53, %v2666_v29 }
 0xdee   :  { %v1931_v60 = vsel %vm1929_vm4, %v2664_v47, %v1930_v22  ;;  %v2035_v5 = vsel %vm2033_vm8, %v2664_v47, %v1930_v22 }
 0xdef   :  { %v1935_v63 = vsel %vm1928_vm7, %v1931_v60, %v1934_v61  ;;  %v2039_v4 = vsel %vm2032_vm12, %v2035_v5, %v2038_v2 }
 0xdf0   :  { %v1936_v3 = vsel %vm1926_vm10, nan, %v1935_v63  ;;  %v2040_v6 = vsel %vm1926_vm10, nan, %v2039_v4 }
 0xdf1   :  { %v2109_v9 = vsub.f32 1.0, %v1936_v3 }
 0xe2c   :  { %v2073_v51 = vpop.permute.xlu1 %2072  ;;  %v2060_v52 = vpop.permute.xlu0 %2059 }
 0xe2d   :  { %v2075_v54 = vmul.f32 %v2073_v51, %v1825_v32  ;;  %v2062_v24 = vmul.f32 %v2060_v52, %v3000_v1  ;;  %v2082_v62 = vmul.f32 %v2060_v52, %v3003_v27 }
 0xe2f   :  { %2077 = vrot.lane.b32.xlu1 %v2075_v54, %s2734_s10  ;;  %2064 = vrot.lane.b32.xlu0 %v2062_v24, %s2732_s8 }
 0xe33   :  { %1821 = vperm.xlu1 %2610, %v2952_v14   ;;  %2084 = vrot.lane.b32.xlu0 %v2082_v62, %s2732_s8 }
 0xe37   :  { %2104 = vperm.xlu0 %2609, %v1936_v3  }
 0xe3b   :  { %2120 = vperm.xlu0 %2609, %v2040_v6  }
 0xe4e   :  { %v2045_v8 = vpop.permute.xlu0 %2044  ;;  %v2051_v14 = vpop.permute.xlu1 %2050 }
 0xe4f   :  { %v2047_v59 = vadd.f32 %v2045_v8, %v2041_v7 }
 0xe51   :  { %v2053_v10 = vadd.f32 %v2051_v14, %v2047_v59 }
 0xe52   :  { %v2069_v12 = vpop.permute.xlu1 %2068  ;;  %v2056_v0 = vpop.permute.xlu0 %2055 }
 0xe53   :  { %v2110_v11 = vmul.f32 %v2109_v9, %v2053_v10  ;;  %v2071_v15 = vmul.f32 %v2069_v12, %v3000_v1  ;;  %v2058_v13 = vmul.f32 %v2056_v0, %v3003_v27  ;;  %v2081_v56 = vmul.f32 %v2056_v0, %v1825_v32 }
 0xe55   :  { %2113 = vperm.xlu1 %2610, %v2110_v11  }
 0xea1   :  { %v2078_v16 = vpop.permute.xlu1 %2077  ;;  %v2065_v18 = vpop.permute.xlu0 %2064 }
 0xea2   :  { %v2080_v19 = vsub.f32 %v2071_v15, %v2078_v16  ;;  %v2067_v20 = vsub.f32 %v2058_v13, %v2065_v18 }
 0xea4   :  { %2093 = vrot.lane.b32.xlu0 %v2080_v19, %s2732_s8  ;;  %2089 = vrot.lane.b32.xlu1 %v2067_v20, %s2732_s8 }
 0xea5   :  { %v2085_v23 = vpop.permute.xlu0 %2084 }
 0xea6   :  { %v2087_v25 = vsub.f32 %v2081_v56, %v2085_v23 }
 0xea8   :  { %2126 = vrot.lane.b32.xlu0 %v1122_v57, %s2735_s11  ;;  %2097 = vrot.lane.b32.xlu1 %v2087_v25, %s2734_s10 }
 0xeac   :  { %2133 = vrot.lane.b32.xlu0 %v2905_v17, %s2736_s12  ;;  %2130 = vrot.lane.b32.xlu1 %v2937_v55, %s2737_s13 }
 0xeb2   :  { %v1822_v27 = vpop.permute.xlu1 %1821 }
 0xeb3   :  { %v1824_v31 = vmul.f32 %v1822_v27, %v2937_v55 }
 0xeb6   :  { %v2105_v1 = vpop.permute.xlu0 %2104 }
 0xeb7   :  { %v2107_v33 = vmul.f32 %v2105_v1, %v2972_v45 }
 0xeb9   :  { %v2108_v37 = vadd.f32 %v2107_v33, %v1122_v57 }
 0xeba   :  { %v2121_v28 = vpop.permute.xlu0 %2120 }
 0xed4   :  { %v2114_v30 = vpop.permute.xlu1 %2113 }
 0xed5   :  { %v2116_v49 = vmul.f32 %v2114_v30, %v1824_v31 }
 0xed7   :  { %v2117_v41 = vadd.f32 %v2116_v49, %v2108_v37 }
 0xf16   :  { %v2090_v35 = vpop.permute.xlu1 %2089  ;;  %v2094_v34 = vpop.permute.xlu0 %2093 }
 0xf17   :  { %v2100_v39 = vsel %vm1554_vm6, %v2090_v35, %v2094_v34 }
 0xf1a   :  { %v2098_v40 = vpop.permute.xlu1 %2097  ;;  %v2127_v26 = vpop.permute.xlu0 %2126 }
 0xf1b   :  { %v2101_v17 = vsel %vm1791_vm11, %v2100_v39, %v2098_v40 }
 0xf1c   :  { %v2123_v42 = vmul.f32 %v2121_v28, %v2101_v17 }
 0xf1e   :  { %v2124_v43 = vadd.f32 %v2123_v42, %v2117_v41  ;;  %v2131_v55 = vpop.permute.xlu1 %2130  ;;  %v2134_v46 = vpop.permute.xlu0 %2133 }
 0xf20   :  { %v2137_v44 = vsel %vm2136_vm13, %v2124_v43, %v2127_v26 }
 0xf21   :  { %v2139_v45 = vsel %vm2138_vm14, %v2137_v44, %v2131_v55 }
 0xf22   :  { %v2141_v36 = vsel %vm2140_vm15, %v2139_v45, %v2134_v46 }
 0xf23   :  { %2143 = vst.msk [vmem:[%s3047_s2] sm:$0xff] %vm2142_vm0, %v2141_v36 }
 0xf24   :  { %2148 = vsyncpa [#allocation3], 1 }
 0xf25   :  { %2149 = vsyncpa [#allocation5], 1 }

</bundles_post_ra>
